<compile_context>
chip_gen: v7x
topology: tpu7x:2x2x1
jax: 0.10.0
libtpu: 0.0.40
codegen_flags: <defaults>
</compile_context>

<pallas_src>
import jax
import jax.numpy as jnp
from jax.experimental import pallas as pl
from jax.experimental.pallas import tpu as pltpu


def _round_up(x, m):
    return (x + m - 1) // m * m


def _vmem_cap(nbytes):
    # Explicit scoped-VMEM request: at least the v6e/v7x default (32 MiB) so the
    # intent is documented, at most 48 MiB so it stays safe on v7x (64 MiB VMEM).
    return int(min(48 * 1024 * 1024, max(32 * 1024 * 1024, int(nbytes * 1.5))))


def _pick_row_tile(n_real_rows, vp, out_block_cap_bytes=6 * 1024 * 1024):
    """Largest row tile (>=128) whose (TM, Vp) f32 output block fits the cap."""
    # TODO(synk): on v7x (64 MiB VMEM / TC) drop the cap to ~2 MiB; 6 MiB targets
    #             v5e/v6e's 128 MiB VMEM (bigger tiles amortize grid-step cost).
    tm = 128
    for cand in (512, 256, 128):
        if cand * vp * 4 <= out_block_cap_bytes:
            tm = cand
            break
    # tiny decode batches only need a single 128-row tile worth of padding
    tm = min(tm, max(128, _round_up(n_real_rows, 128)))
    return tm


# --------------------------------------------------------------------------- #
# Kernel 1: embedding gather + hoisted input projection + LSTM recurrence.
# --------------------------------------------------------------------------- #
def lstm_kernel(ids_ref, emb_ref, wih_ref, whh_ref, b_ref, h0_ref, c0_ref,
                dec_ref, hT_ref, cT_ref, xg_sc, dec_sc):
    Bp, Hp = h0_ref.shape
    N = ids_ref.shape[0]              # = T * Bp, time-major token ids
    T = N // Bp

    # (1) embedding gather: token id -> row of the (V, Ep) table (no one-hot).
    # TODO(synk): for production vocab keep the table in HBM (pl.ANY) and DMA
    #             only the N needed rows (bf16) with make_async_copy
    #             double-buffering instead of keeping the full table in VMEM.
    @pl.loop(0, N)
    def _(n):
        tok = ids_ref[n]
        xg_sc[pl.ds(n, 1), :] = emb_ref[pl.ds(tok, 1), :]

    # (2) hoisted, non-recurrent input projection for ALL time steps at once:
    #     one (T*Bp, Ep) @ (Ep, 4Hp) bf16 matmul, bias folded in (read once).
    xp = (jnp.dot(xg_sc[...].astype(jnp.bfloat16), wih_ref[...],
                  preferred_element_type=jnp.float32)
          + b_ref[...])                                         # (N, 4Hp) f32

    whh = whh_ref[...]                                          # (Hp, 4Hp) bf16
    h = h0_ref[...]
    c = c0_ref[...]

    # rows >= Bp*T of the row-padded decoder-output buffer stay exactly zero
    dec_sc[...] = jnp.zeros_like(dec_sc)

    # (3) recurrence: only h @ W_hh + elementwise gate math is serial.
    #     T is small at decode time -> static unroll (full LLO visibility).
    # TODO(synk): for moderate-to-large T switch to lax.fori_loop(..., unroll=k)
    #             carrying (h, c) to bound live ranges / vreg pressure.
    for t in range(T):
        gates = xp[t * Bp:(t + 1) * Bp, :] + jnp.dot(
            h.astype(jnp.bfloat16), whh, preferred_element_type=jnp.float32)
        # lane-aligned gate slices (Hp multiple of 128), PyTorch order i,f,g,o
        i = jax.nn.sigmoid(gates[:, 0 * Hp:1 * Hp])
        f = jax.nn.sigmoid(gates[:, 1 * Hp:2 * Hp])
        g = jnp.tanh(gates[:, 2 * Hp:3 * Hp])
        o = jax.nn.sigmoid(gates[:, 3 * Hp:4 * Hp])
        c = f * c + i * g
        h = o * jnp.tanh(c)
        # ONE sublane-strided store per step: rows b*T + t for all b (the b-major
        # layout the FF kernel consumes). Replaces Bp masked single-row stores
        # and the per-row cross-sublane extraction of h. Start/size/stride are
        # all static here (t is a Python int).
        dec_sc[pl.ds(t, Bp, stride=T), :] = h

    # single bulk cast+store: bf16 HBM writeback halves the inter-kernel traffic
    dec_ref[...] = dec_sc[...].astype(dec_ref.dtype)
    hT_ref[...] = h
    cT_ref[...] = c


# --------------------------------------------------------------------------- #
# Kernel 2: [dec | ctx] @ W1 -> @ W2 -> softmax, tiled & pipelined over rows.
# --------------------------------------------------------------------------- #
def ff_softmax_kernel(dec_ref, ctx_ref, w1a_ref, w1b_ref, b1_ref, w2_ref,
                      b2_ref, p_ref):
    dec = dec_ref[...]                                          # (TM, Hp) bf16
    ctx = ctx_ref[...]                                          # (TM, Cp) bf16
    # the concat is folded into two matmuls against the split W1
    ff1 = (jnp.dot(dec, w1a_ref[...], preferred_element_type=jnp.float32)
           + jnp.dot(ctx, w1b_ref[...], preferred_element_type=jnp.float32)
           + b1_ref[...])                                       # (TM, Hp) f32
    ff2 = (jnp.dot(ff1.astype(jnp.bfloat16), w2_ref[...],
                   preferred_element_type=jnp.float32)
           + b2_ref[...])                                       # (TM, Vp) f32
    # b2 is -1e30 in the padded vocab columns -> exp underflows to exactly 0,
    # so padded lanes carry no probability mass. (Relies on real logits being
    # nowhere near -1e30, which holds for any finite model output.)
    m = jnp.max(ff2, axis=-1, keepdims=True)
    e = jnp.exp(ff2 - m)
    s = jnp.sum(e, axis=-1, keepdims=True)
    # approx reciprocal runs on the EUP (free slot); each row sums to ~1
    # (EUP reciprocal rel-err ~1e-3), not exactly 1.
    p_ref[...] = e * pl.reciprocal(s, approx=True)
    # TODO(synk): emit bf16 probabilities (or log-probs) if the consumer allows;
    #             at large V the f32 (TM, Vp) writeback dominates this kernel.


# --------------------------------------------------------------------------- #
# Wrapper
# --------------------------------------------------------------------------- #
def init_params(key, vocab_size, embed_size, hidden_size):
    ks = jax.random.split(key, 9)
    s = 0.1
    return dict(
        embedding=jax.random.normal(ks[0], (vocab_size, embed_size), jnp.float32) * s,
        w_ih=jax.random.normal(ks[1], (4 * hidden_size, embed_size), jnp.float32) * s,
        w_hh=jax.random.normal(ks[2], (4 * hidden_size, hidden_size), jnp.float32) * s,
        b_ih=jax.random.normal(ks[3], (4 * hidden_size,), jnp.float32) * s,
        b_hh=jax.random.normal(ks[4], (4 * hidden_size,), jnp.float32) * s,
        w1=jax.random.normal(ks[5], (hidden_size, 3 * hidden_size), jnp.float32) * s,
        b1=jax.random.normal(ks[6], (hidden_size,), jnp.float32) * s,
        w2=jax.random.normal(ks[7], (vocab_size, hidden_size), jnp.float32) * s,
        b2=jax.random.normal(ks[8], (vocab_size,), jnp.float32) * s,
    )


@jax.jit
def decoder_forward(params, decoder_input, decoder_states, context_vector):
    V, E = params["embedding"].shape
    H = params["w_hh"].shape[1]
    B, T = decoder_input.shape

    Bp = _round_up(B, 8)               # sublane padding for the batch
    Hp = _round_up(H, 128)             # lane padding -> aligned gate slices
    Ep = _round_up(E, 128)
    Vp = _round_up(V, 128)             # lane-dense softmax output
    Cp = _round_up(2 * H, 128)

    TM = _pick_row_tile(Bp * T, Vp)    # FF row tile, always >= 128
    Nr = _round_up(Bp * T, TM)         # row-padded count for dec_out / FF kernel
    N = Bp * T                         # real (padded-batch) rows in the LSTM

    # ---- glue: zero-pad weights / state (exact) + time-major ids ----
    # clip keeps the gather in-bounds (invalid ids silently map to valid rows)
    ids = jnp.clip(decoder_input, 0, V - 1).astype(jnp.int32)
    ids_tm = jnp.pad(ids, ((0, Bp - B), (0, 0))).T.reshape(N)

    emb_p = jnp.pad(params["embedding"], ((0, 0), (0, Ep - E))).astype(jnp.float32)
    wih_p = jnp.pad(params["w_ih"].T.reshape(E, 4, H),
                    ((0, Ep - E), (0, 0), (0, Hp - H))
                    ).reshape(Ep, 4 * Hp).astype(jnp.bfloat16)
    whh_p = jnp.pad(params["w_hh"].T.reshape(H, 4, H),
                    ((0, Hp - H), (0, 0), (0, Hp - H))
                    ).reshape(Hp, 4 * Hp).astype(jnp.bfloat16)
    bias_p = jnp.pad((params["b_ih"] + params["b_hh"]).reshape(4, H),
                     ((0, 0), (0, Hp - H))).reshape(1, 4 * Hp).astype(jnp.float32)

    h0 = jnp.pad(decoder_states[0][0], ((0, Bp - B), (0, Hp - H))).astype(jnp.float32)
    c0 = jnp.pad(decoder_states[1][0], ((0, Bp - B), (0, Hp - H))).astype(jnp.float32)

    vmem = pltpu.MemorySpace.VMEM
    smem = pltpu.MemorySpace.SMEM

    lstm_bytes = (V * Ep * 4 + Ep * 4 * Hp * 2 + Hp * 4 * Hp * 2 + 4 * Hp * 4
                  + 4 * Bp * Hp * 4 + Nr * Hp * 2
                  + N * Ep * 4 + Nr * Hp * 4 + N * 4 * Hp * 4)

    dec_out, hT, cT = pl.pallas_call(
        lstm_kernel,
        out_shape=(jax.ShapeDtypeStruct((Nr, Hp), jnp.bfloat16),  # b-major (b*T+t) rows
                   jax.ShapeDtypeStruct((Bp, Hp), jnp.float32),
                   jax.ShapeDtypeStruct((Bp, Hp), jnp.float32)),
        in_specs=[pl.BlockSpec(memory_space=smem)]                # token ids
                 + [pl.BlockSpec(memory_space=vmem)] * 6,
        out_specs=(pl.BlockSpec(memory_space=vmem),) * 3,
        scratch_shapes=[pltpu.VMEM((N, Ep), jnp.float32),         # gathered embeddings
                        pltpu.VMEM((Nr, Hp), jnp.float32)],       # f32 staging for dec
        compiler_params=pltpu.CompilerParams(
            vmem_limit_bytes=_vmem_cap(lstm_bytes)),
        # TODO(synk): on v7x split the (batch-independent) recurrence across the
        #             two TensorCores with a size-2 "parallel" grid axis.
    )(ids_tm, emb_p, wih_p, whh_p, bias_p, h0, c0)

    # ---- FF + softmax: row-tiled grid, resident weights, lane-dense output ----
    w1_t = params["w1"].T                                         # (3H, H)
    w1a_p = jnp.pad(w1_t[:H, :], ((0, Hp - H), (0, Hp - H))).astype(jnp.bfloat16)
    w1b_p = jnp.pad(w1_t[H:, :], ((0, Cp - 2 * H), (0, Hp - H))).astype(jnp.bfloat16)
    b1_p = jnp.pad(params["b1"].reshape(1, H), ((0, 0), (0, Hp - H))).astype(jnp.float32)
    w2_p = jnp.pad(params["w2"].T, ((0, Hp - H), (0, Vp - V))).astype(jnp.bfloat16)
    b2_p = jnp.pad(params["b2"].reshape(1, V), ((0, 0), (0, Vp - V)),
                   constant_values=-1e30).astype(jnp.float32)     # mask padded vocab

    ctx_p = jnp.pad(context_vector,
                    ((0, Nr - B * T), (0, Cp - 2 * H))).astype(jnp.bfloat16)

    grid = (Nr // TM,)
    ff_bytes = 2 * ((Hp * Hp + Cp * Hp + Hp * Vp) * 2 + (Hp + Vp) * 4
                    + TM * (Hp * 2 + Cp * 2 + Vp * 4))

    p_pad = pl.pallas_call(
        ff_softmax_kernel,
        out_shape=jax.ShapeDtypeStruct((Nr, Vp), jnp.float32),
        grid=grid,
        in_specs=[
            pl.BlockSpec((TM, Hp), lambda i: (i, 0)),     # decoder rows (tiled, bf16)
            pl.BlockSpec((TM, Cp), lambda i: (i, 0)),     # context rows (tiled, bf16)
            # TODO(synk): pipeline_mode=pl.Buffered(1) on these constant-index
            #             weight specs to halve resident VMEM on v7x.
            pl.BlockSpec((Hp, Hp), lambda i: (0, 0)),     # W1 (dec half), resident
            pl.BlockSpec((Cp, Hp), lambda i: (0, 0)),     # W1 (ctx half), resident
            pl.BlockSpec((1, Hp), lambda i: (0, 0)),      # b1
            # TODO(synk): for production V, tile Vp as a second grid axis with a
            #             two-pass softmax instead of keeping W2 fully resident.
            pl.BlockSpec((Hp, Vp), lambda i: (0, 0)),     # W2, resident
            pl.BlockSpec((1, Vp), lambda i: (0, 0)),      # b2 (padded cols = -1e30)
        ],
        out_specs=pl.BlockSpec((TM, Vp), lambda i: (i, 0)),
        compiler_params=pltpu.CompilerParams(
            dimension_semantics=("parallel",),
            vmem_limit_bytes=_vmem_cap(ff_bytes)),
    )(dec_out, ctx_p, w1a_p, w1b_p, b1_p, w2_p, b2_p)

    p_vocab = p_pad[:B * T, :V]
    return p_vocab, (hT[:B, :H][None], cT[:B, :H][None])


# pure-JAX reference (mirrors the PyTorch forward) for a correctness check
def decoder_forward_ref(params, decoder_input, decoder_states, context_vector):
    V, E = params["embedding"].shape
    H = params["w_hh"].shape[1]
    B, T = decoder_input.shape
    emb = params["embedding"][decoder_input]                    # (B, T, E)
    h, c = decoder_states[0][0], decoder_states[1][0]
    outs = []
    for t in range(T):
        x_t = emb[:, t, :]
        gates = x_t @ params["w_ih"].T + h @ params["w_hh"].T + params["b_ih"] + params["b_hh"]
        i = jax.nn.sigmoid(gates[:, 0:H])
        f = jax.nn.sigmoid(gates[:, H:2 * H])
        g = jnp.tanh(gates[:, 2 * H:3 * H])
        o = jax.nn.sigmoid(gates[:, 3 * H:4 * H])
        c = f * c + i * g
        h = o * jnp.tanh(c)
        outs.append(h)
    dec_out = jnp.stack(outs, axis=1).reshape(B * T, H)
    cat = jnp.concatenate([dec_out, context_vector], axis=-1)
    ff1 = cat @ params["w1"].T + params["b1"]
    ff2 = ff1 @ params["w2"].T + params["b2"]
    return jax.nn.softmax(ff2, axis=1), (h[None], c[None])


if __name__ == "__main__":
    vocab_size, embed_size, hidden_size = 50, 16, 32
    B, T = 2, 3

    key = jax.random.PRNGKey(0)
    k_par, k_in, k_h, k_c, k_ctx = jax.random.split(key, 5)

    params = init_params(k_par, vocab_size, embed_size, hidden_size)
    decoder_input = jax.random.randint(k_in, (B, T), 0, vocab_size, dtype=jnp.int32)
    h0 = jax.random.normal(k_h, (1, B, hidden_size), jnp.float32)
    c0 = jax.random.normal(k_c, (1, B, hidden_size), jnp.float32)
    context_vector = jax.random.normal(k_ctx, (B * T, 2 * hidden_size), jnp.float32)

    p_vocab, (hT, cT) = decoder_forward(params, decoder_input, (h0, c0), context_vector)
    jax.block_until_ready((p_vocab, hT, cT))

    p_ref, (h_ref, c_ref) = decoder_forward_ref(params, decoder_input, (h0, c0), context_vector)
    assert p_vocab.shape == (B * T, vocab_size)
    assert hT.shape == (1, B, hidden_size) and cT.shape == (1, B, hidden_size)
    # bf16 matmul operands (f32 accumulation) -> slightly looser tolerance than pure f32
    assert jnp.allclose(p_vocab, p_ref, rtol=2e-2, atol=2e-3)
    assert jnp.allclose(hT, h_ref, rtol=2e-2, atol=2e-3)
    assert jnp.allclose(cT, c_ref, rtol=2e-2, atol=2e-3)

    print("KERNEL_OK")
</pallas_src>

<mosaic_0001>
module attributes {stable_mosaic.version = 11 : i64} {
  func.func @lstm_kernel(%arg0: memref<24xi32, #tpu.memory_space<smem>>, %arg1: memref<50x128xf32, #tpu.memory_space<vmem>>, %arg2: memref<128x512xbf16, #tpu.memory_space<vmem>>, %arg3: memref<128x512xbf16, #tpu.memory_space<vmem>>, %arg4: memref<1x512xf32, #tpu.memory_space<vmem>>, %arg5: memref<8x128xf32, #tpu.memory_space<vmem>>, %arg6: memref<8x128xf32, #tpu.memory_space<vmem>>, %arg7: memref<128x128xbf16, #tpu.memory_space<vmem>>, %arg8: memref<8x128xf32, #tpu.memory_space<vmem>>, %arg9: memref<8x128xf32, #tpu.memory_space<vmem>>, %arg10: memref<24x128xf32, #tpu.memory_space<vmem>>, %arg11: memref<128x128xf32, #tpu.memory_space<vmem>>) attributes {dimension_semantics = [], scalar_prefetch = 0 : i64, scratch_operands = 2 : i64, tpu.core_type = #tpu.core_type<tc>} {
    %c0_i32 = arith.constant 0 : i32
    %c24_i32 = arith.constant 24 : i32
    %0 = arith.addi %c0_i32, %c24_i32 : i32
    %c1_i32 = arith.constant 1 : i32
    scf.for %arg12 = %c0_i32 to %0 step %c1_i32  : i32 {
      %c1_i32_39 = arith.constant 1 : i32
      %108 = arith.muli %arg12, %c1_i32_39 : i32
      %c0_i32_40 = arith.constant 0 : i32
      %109 = arith.addi %c0_i32_40, %108 : i32
      %110 = arith.index_cast %109 : i32 to index
      %111 = memref.load %arg0[%110] : memref<24xi32, #tpu.memory_space<smem>>
      %112 = arith.index_cast %111 : i32 to index
      %c0_41 = arith.constant 0 : index
      %113 = vector.load %arg1[%112, %c0_41] : memref<50x128xf32, #tpu.memory_space<vmem>>, vector<1x128xf32>
      %114 = arith.index_cast %109 : i32 to index
      %c0_42 = arith.constant 0 : index
      %115 = vector.load %arg10[%114, %c0_42] : memref<24x128xf32, #tpu.memory_space<vmem>>, vector<1x128xf32>
      tpu.vector_store %arg10[%114, %c0_42], %113 {strides = array<i32>} : memref<24x128xf32, #tpu.memory_space<vmem>>, vector<1x128xf32>,
    }
    %c24_i32_0 = arith.constant 24 : i32
    %c0 = arith.constant 0 : index
    %c0_1 = arith.constant 0 : index
    %1 = vector.load %arg10[%c0, %c0_1] : memref<24x128xf32, #tpu.memory_space<vmem>>, vector<24x128xf32>
    %2 = arith.truncf %1 : vector<24x128xf32> to vector<24x128xbf16>
    %c0_2 = arith.constant 0 : index
    %c0_3 = arith.constant 0 : index
    %3 = vector.load %arg2[%c0_2, %c0_3] : memref<128x512xbf16, #tpu.memory_space<vmem>>, vector<128x512xbf16>
    %cst = arith.constant dense<0.000000e+00> : vector<24x512xf32>
    %4 = tpu.matmul %2, %3, %cst {dimension_numbers = #tpu.dot_dimension_numbers<[1], [0], [0], [1], [0, 0, 1, 1], [], []>} : vector<24x128xbf16>, vector<128x512xbf16>, vector<24x512xf32> -> vector<24x512xf32>
    %c0_4 = arith.constant 0 : index
    %c0_5 = arith.constant 0 : index
    %5 = vector.load %arg4[%c0_4, %c0_5] : memref<1x512xf32, #tpu.memory_space<vmem>>, vector<1x512xf32>
    %6 = vector.broadcast %5 : vector<1x512xf32> to vector<24x512xf32>
    %7 = arith.addf %4, %6 : vector<24x512xf32>
    %c0_6 = arith.constant 0 : index
    %c0_7 = arith.constant 0 : index
    %8 = vector.load %arg3[%c0_6, %c0_7] : memref<128x512xbf16, #tpu.memory_space<vmem>>, vector<128x512xbf16>
    %c0_8 = arith.constant 0 : index
    %c0_9 = arith.constant 0 : index
    %9 = vector.load %arg5[%c0_8, %c0_9] : memref<8x128xf32, #tpu.memory_space<vmem>>, vector<8x128xf32>
    %c0_10 = arith.constant 0 : index
    %c0_11 = arith.constant 0 : index
    %10 = vector.load %arg6[%c0_10, %c0_11] : memref<8x128xf32, #tpu.memory_space<vmem>>, vector<8x128xf32>
    %cst_12 = arith.constant 0.000000e+00 : f32
    %11 = vector.broadcast %cst_12 : f32 to vector<128x128xf32>
    %c0_13 = arith.constant 0 : index
    %c0_14 = arith.constant 0 : index
    %12 = vector.load %arg11[%c0_13, %c0_14] : memref<128x128xf32, #tpu.memory_space<vmem>>, vector<128x128xf32>
    tpu.vector_store %arg11[%c0_13, %c0_14], %11 {strides = array<i32>} : memref<128x128xf32, #tpu.memory_space<vmem>>, vector<128x128xf32>,
    %13 = vector.extract_strided_slice %7 {offsets = [0, 0], sizes = [8, 512], strides = [1, 1]} : vector<24x512xf32> to vector<8x512xf32>
    %14 = arith.truncf %9 : vector<8x128xf32> to vector<8x128xbf16>
    %cst_15 = arith.constant dense<0.000000e+00> : vector<8x512xf32>
    %15 = tpu.matmul %14, %8, %cst_15 {dimension_numbers = #tpu.dot_dimension_numbers<[1], [0], [0], [1], [0, 0, 1, 1], [], []>} : vector<8x128xbf16>, vector<128x512xbf16>, vector<8x512xf32> -> vector<8x512xf32>
    %16 = arith.addf %13, %15 : vector<8x512xf32>
    %17 = vector.extract_strided_slice %16 {offsets = [0, 0], sizes = [8, 128], strides = [1, 1]} : vector<8x512xf32> to vector<8x128xf32>
    %18 = arith.negf %17 : vector<8x128xf32>
    %19 = math.exp %18 : vector<8x128xf32>
    %cst_16 = arith.constant 1.000000e+00 : f32
    %20 = vector.broadcast %cst_16 : f32 to vector<8x128xf32>
    %21 = arith.addf %20, %19 : vector<8x128xf32>
    %22 = arith.divf %20, %21 : vector<8x128xf32>
    %23 = vector.extract_strided_slice %16 {offsets = [0, 128], sizes = [8, 128], strides = [1, 1]} : vector<8x512xf32> to vector<8x128xf32>
    %24 = arith.negf %23 : vector<8x128xf32>
    %25 = math.exp %24 : vector<8x128xf32>
    %cst_17 = arith.constant 1.000000e+00 : f32
    %26 = vector.broadcast %cst_17 : f32 to vector<8x128xf32>
    %27 = arith.addf %26, %25 : vector<8x128xf32>
    %28 = arith.divf %26, %27 : vector<8x128xf32>
    %29 = vector.extract_strided_slice %16 {offsets = [0, 256], sizes = [8, 128], strides = [1, 1]} : vector<8x512xf32> to vector<8x128xf32>
    %30 = math.tanh %29 : vector<8x128xf32>
    %31 = vector.extract_strided_slice %16 {offsets = [0, 384], sizes = [8, 128], strides = [1, 1]} : vector<8x512xf32> to vector<8x128xf32>
    %32 = arith.negf %31 : vector<8x128xf32>
    %33 = math.exp %32 : vector<8x128xf32>
    %cst_18 = arith.constant 1.000000e+00 : f32
    %34 = vector.broadcast %cst_18 : f32 to vector<8x128xf32>
    %35 = arith.addf %34, %33 : vector<8x128xf32>
    %36 = arith.divf %34, %35 : vector<8x128xf32>
    %37 = arith.mulf %28, %10 : vector<8x128xf32>
    %38 = arith.mulf %22, %30 : vector<8x128xf32>
    %39 = arith.addf %37, %38 : vector<8x128xf32>
    %40 = math.tanh %39 : vector<8x128xf32>
    %41 = arith.mulf %36, %40 : vector<8x128xf32>
    %c0_19 = arith.constant 0 : index
    %c0_20 = arith.constant 0 : index
    %42 = tpu.strided_load %arg11[%c0_19, %c0_20] {strides = array<i32: 3, 1>} : memref<128x128xf32, #tpu.memory_space<vmem>>, vector<8x128xf32>
    tpu.strided_store %arg11[%c0_19, %c0_20], %41 {strides = array<i32: 3, 1>} : memref<128x128xf32, #tpu.memory_space<vmem>>, vector<8x128xf32>
    %43 = vector.extract_strided_slice %7 {offsets = [8, 0], sizes = [8, 512], strides = [1, 1]} : vector<24x512xf32> to vector<8x512xf32>
    %44 = arith.truncf %41 : vector<8x128xf32> to vector<8x128xbf16>
    %cst_21 = arith.constant dense<0.000000e+00> : vector<8x512xf32>
    %45 = tpu.matmul %44, %8, %cst_21 {dimension_numbers = #tpu.dot_dimension_numbers<[1], [0], [0], [1], [0, 0, 1, 1], [], []>} : vector<8x128xbf16>, vector<128x512xbf16>, vector<8x512xf32> -> vector<8x512xf32>
    %46 = arith.addf %43, %45 : vector<8x512xf32>
    %47 = vector.extract_strided_slice %46 {offsets = [0, 0], sizes = [8, 128], strides = [1, 1]} : vector<8x512xf32> to vector<8x128xf32>
    %48 = arith.negf %47 : vector<8x128xf32>
    %49 = math.exp %48 : vector<8x128xf32>
    %cst_22 = arith.constant 1.000000e+00 : f32
    %50 = vector.broadcast %cst_22 : f32 to vector<8x128xf32>
    %51 = arith.addf %50, %49 : vector<8x128xf32>
    %52 = arith.divf %50, %51 : vector<8x128xf32>
    %53 = vector.extract_strided_slice %46 {offsets = [0, 128], sizes = [8, 128], strides = [1, 1]} : vector<8x512xf32> to vector<8x128xf32>
    %54 = arith.negf %53 : vector<8x128xf32>
    %55 = math.exp %54 : vector<8x128xf32>
    %cst_23 = arith.constant 1.000000e+00 : f32
    %56 = vector.broadcast %cst_23 : f32 to vector<8x128xf32>
    %57 = arith.addf %56, %55 : vector<8x128xf32>
    %58 = arith.divf %56, %57 : vector<8x128xf32>
    %59 = vector.extract_strided_slice %46 {offsets = [0, 256], sizes = [8, 128], strides = [1, 1]} : vector<8x512xf32> to vector<8x128xf32>
    %60 = math.tanh %59 : vector<8x128xf32>
    %61 = vector.extract_strided_slice %46 {offsets = [0, 384], sizes = [8, 128], strides = [1, 1]} : vector<8x512xf32> to vector<8x128xf32>
    %62 = arith.negf %61 : vector<8x128xf32>
    %63 = math.exp %62 : vector<8x128xf32>
    %cst_24 = arith.constant 1.000000e+00 : f32
    %64 = vector.broadcast %cst_24 : f32 to vector<8x128xf32>
    %65 = arith.addf %64, %63 : vector<8x128xf32>
    %66 = arith.divf %64, %65 : vector<8x128xf32>
    %67 = arith.mulf %58, %39 : vector<8x128xf32>
    %68 = arith.mulf %52, %60 : vector<8x128xf32>
    %69 = arith.addf %67, %68 : vector<8x128xf32>
    %70 = math.tanh %69 : vector<8x128xf32>
    %71 = arith.mulf %66, %70 : vector<8x128xf32>
    %c1 = arith.constant 1 : index
    %c0_25 = arith.constant 0 : index
    %72 = tpu.strided_load %arg11[%c1, %c0_25] {strides = array<i32: 3, 1>} : memref<128x128xf32, #tpu.memory_space<vmem>>, vector<8x128xf32>
    tpu.strided_store %arg11[%c1, %c0_25], %71 {strides = array<i32: 3, 1>} : memref<128x128xf32, #tpu.memory_space<vmem>>, vector<8x128xf32>
    %73 = vector.extract_strided_slice %7 {offsets = [16, 0], sizes = [8, 512], strides = [1, 1]} : vector<24x512xf32> to vector<8x512xf32>
    %74 = arith.truncf %71 : vector<8x128xf32> to vector<8x128xbf16>
    %cst_26 = arith.constant dense<0.000000e+00> : vector<8x512xf32>
    %75 = tpu.matmul %74, %8, %cst_26 {dimension_numbers = #tpu.dot_dimension_numbers<[1], [0], [0], [1], [0, 0, 1, 1], [], []>} : vector<8x128xbf16>, vector<128x512xbf16>, vector<8x512xf32> -> vector<8x512xf32>
    %76 = arith.addf %73, %75 : vector<8x512xf32>
    %77 = vector.extract_strided_slice %76 {offsets = [0, 0], sizes = [8, 128], strides = [1, 1]} : vector<8x512xf32> to vector<8x128xf32>
    %78 = arith.negf %77 : vector<8x128xf32>
    %79 = math.exp %78 : vector<8x128xf32>
    %cst_27 = arith.constant 1.000000e+00 : f32
    %80 = vector.broadcast %cst_27 : f32 to vector<8x128xf32>
    %81 = arith.addf %80, %79 : vector<8x128xf32>
    %82 = arith.divf %80, %81 : vector<8x128xf32>
    %83 = vector.extract_strided_slice %76 {offsets = [0, 128], sizes = [8, 128], strides = [1, 1]} : vector<8x512xf32> to vector<8x128xf32>
    %84 = arith.negf %83 : vector<8x128xf32>
    %85 = math.exp %84 : vector<8x128xf32>
    %cst_28 = arith.constant 1.000000e+00 : f32
    %86 = vector.broadcast %cst_28 : f32 to vector<8x128xf32>
    %87 = arith.addf %86, %85 : vector<8x128xf32>
    %88 = arith.divf %86, %87 : vector<8x128xf32>
    %89 = vector.extract_strided_slice %76 {offsets = [0, 256], sizes = [8, 128], strides = [1, 1]} : vector<8x512xf32> to vector<8x128xf32>
    %90 = math.tanh %89 : vector<8x128xf32>
    %91 = vector.extract_strided_slice %76 {offsets = [0, 384], sizes = [8, 128], strides = [1, 1]} : vector<8x512xf32> to vector<8x128xf32>
    %92 = arith.negf %91 : vector<8x128xf32>
    %93 = math.exp %92 : vector<8x128xf32>
    %cst_29 = arith.constant 1.000000e+00 : f32
    %94 = vector.broadcast %cst_29 : f32 to vector<8x128xf32>
    %95 = arith.addf %94, %93 : vector<8x128xf32>
    %96 = arith.divf %94, %95 : vector<8x128xf32>
    %97 = arith.mulf %88, %69 : vector<8x128xf32>
    %98 = arith.mulf %82, %90 : vector<8x128xf32>
    %99 = arith.addf %97, %98 : vector<8x128xf32>
    %100 = math.tanh %99 : vector<8x128xf32>
    %101 = arith.mulf %96, %100 : vector<8x128xf32>
    %c2 = arith.constant 2 : index
    %c0_30 = arith.constant 0 : index
    %102 = tpu.strided_load %arg11[%c2, %c0_30] {strides = array<i32: 3, 1>} : memref<128x128xf32, #tpu.memory_space<vmem>>, vector<8x128xf32>
    tpu.strided_store %arg11[%c2, %c0_30], %101 {strides = array<i32: 3, 1>} : memref<128x128xf32, #tpu.memory_space<vmem>>, vector<8x128xf32>
    %c0_31 = arith.constant 0 : index
    %c0_32 = arith.constant 0 : index
    %103 = vector.load %arg11[%c0_31, %c0_32] : memref<128x128xf32, #tpu.memory_space<vmem>>, vector<128x128xf32>
    %104 = arith.truncf %103 : vector<128x128xf32> to vector<128x128xbf16>
    %c0_33 = arith.constant 0 : index
    %c0_34 = arith.constant 0 : index
    %105 = vector.load %arg7[%c0_33, %c0_34] : memref<128x128xbf16, #tpu.memory_space<vmem>>, vector<128x128xbf16>
    tpu.vector_store %arg7[%c0_33, %c0_34], %104 {strides = array<i32>} : memref<128x128xbf16, #tpu.memory_space<vmem>>, vector<128x128xbf16>,
    %c0_35 = arith.constant 0 : index
    %c0_36 = arith.constant 0 : index
    %106 = vector.load %arg8[%c0_35, %c0_36] : memref<8x128xf32, #tpu.memory_space<vmem>>, vector<8x128xf32>
    tpu.vector_store %arg8[%c0_35, %c0_36], %101 {strides = array<i32>} : memref<8x128xf32, #tpu.memory_space<vmem>>, vector<8x128xf32>,
    %c0_37 = arith.constant 0 : index
    %c0_38 = arith.constant 0 : index
    %107 = vector.load %arg9[%c0_37, %c0_38] : memref<8x128xf32, #tpu.memory_space<vmem>>, vector<8x128xf32>
    tpu.vector_store %arg9[%c0_37, %c0_38], %99 {strides = array<i32>} : memref<8x128xf32, #tpu.memory_space<vmem>>, vector<8x128xf32>,
    return
  }
}

module attributes {stable_mosaic.version = 11 : i64} {
  func.func @ff_softmax_kernel(%arg0: i32, %arg1: memref<128x128xbf16, #tpu.memory_space<vmem>>, %arg2: memref<128x128xbf16, #tpu.memory_space<vmem>>, %arg3: memref<128x128xbf16, #tpu.memory_space<vmem>>, %arg4: memref<128x128xbf16, #tpu.memory_space<vmem>>, %arg5: memref<1x128xf32, #tpu.memory_space<vmem>>, %arg6: memref<128x128xbf16, #tpu.memory_space<vmem>>, %arg7: memref<1x128xf32, #tpu.memory_space<vmem>>, %arg8: memref<128x128xf32, #tpu.memory_space<vmem>>) attributes {dimension_semantics = [#tpu.dimension_semantics<parallel>], iteration_bounds = array<i64: 1>, scalar_prefetch = 0 : i64, scratch_operands = 0 : i64, tpu.core_type = #tpu.core_type<tc>, window_params = [{transform_indices = @transform_0, window_bounds = array<i64: 128, 128>}, {transform_indices = @transform_1, window_bounds = array<i64: 128, 128>}, {pipeline_mode = #tpu.pipeline_mode<synchronous>, transform_indices = @transform_2, window_bounds = array<i64: 128, 128>}, {pipeline_mode = #tpu.pipeline_mode<synchronous>, transform_indices = @transform_3, window_bounds = array<i64: 128, 128>}, {pipeline_mode = #tpu.pipeline_mode<synchronous>, transform_indices = @transform_4, window_bounds = array<i64: 1, 128>}, {pipeline_mode = #tpu.pipeline_mode<synchronous>, transform_indices = @transform_5, window_bounds = array<i64: 128, 128>}, {pipeline_mode = #tpu.pipeline_mode<synchronous>, transform_indices = @transform_6, window_bounds = array<i64: 1, 128>}, {transform_indices = @transform_7, window_bounds = array<i64: 128, 128>}]} {
    %c0 = arith.constant 0 : index
    %c0_0 = arith.constant 0 : index
    %0 = vector.load %arg1[%c0, %c0_0] : memref<128x128xbf16, #tpu.memory_space<vmem>>, vector<128x128xbf16>
    %c0_1 = arith.constant 0 : index
    %c0_2 = arith.constant 0 : index
    %1 = vector.load %arg2[%c0_1, %c0_2] : memref<128x128xbf16, #tpu.memory_space<vmem>>, vector<128x128xbf16>
    %c0_3 = arith.constant 0 : index
    %c0_4 = arith.constant 0 : index
    %2 = vector.load %arg3[%c0_3, %c0_4] : memref<128x128xbf16, #tpu.memory_space<vmem>>, vector<128x128xbf16>
    %cst = arith.constant dense<0.000000e+00> : vector<128x128xf32>
    %3 = tpu.matmul %0, %2, %cst {dimension_numbers = #tpu.dot_dimension_numbers<[1], [0], [0], [1], [0, 0, 1, 1], [], []>} : vector<128x128xbf16>, vector<128x128xbf16>, vector<128x128xf32> -> vector<128x128xf32>
    %c0_5 = arith.constant 0 : index
    %c0_6 = arith.constant 0 : index
    %4 = vector.load %arg4[%c0_5, %c0_6] : memref<128x128xbf16, #tpu.memory_space<vmem>>, vector<128x128xbf16>
    %cst_7 = arith.constant dense<0.000000e+00> : vector<128x128xf32>
    %5 = tpu.matmul %1, %4, %cst_7 {dimension_numbers = #tpu.dot_dimension_numbers<[1], [0], [0], [1], [0, 0, 1, 1], [], []>} : vector<128x128xbf16>, vector<128x128xbf16>, vector<128x128xf32> -> vector<128x128xf32>
    %6 = arith.addf %3, %5 : vector<128x128xf32>
    %c0_8 = arith.constant 0 : index
    %c0_9 = arith.constant 0 : index
    %7 = vector.load %arg5[%c0_8, %c0_9] : memref<1x128xf32, #tpu.memory_space<vmem>>, vector<1x128xf32>
    %8 = vector.broadcast %7 : vector<1x128xf32> to vector<128x128xf32>
    %9 = arith.addf %6, %8 : vector<128x128xf32>
    %10 = arith.truncf %9 : vector<128x128xf32> to vector<128x128xbf16>
    %c0_10 = arith.constant 0 : index
    %c0_11 = arith.constant 0 : index
    %11 = vector.load %arg6[%c0_10, %c0_11] : memref<128x128xbf16, #tpu.memory_space<vmem>>, vector<128x128xbf16>
    %cst_12 = arith.constant dense<0.000000e+00> : vector<128x128xf32>
    %12 = tpu.matmul %10, %11, %cst_12 {dimension_numbers = #tpu.dot_dimension_numbers<[1], [0], [0], [1], [0, 0, 1, 1], [], []>} : vector<128x128xbf16>, vector<128x128xbf16>, vector<128x128xf32> -> vector<128x128xf32>
    %c0_13 = arith.constant 0 : index
    %c0_14 = arith.constant 0 : index
    %13 = vector.load %arg7[%c0_13, %c0_14] : memref<1x128xf32, #tpu.memory_space<vmem>>, vector<1x128xf32>
    %14 = vector.broadcast %13 : vector<1x128xf32> to vector<128x128xf32>
    %15 = arith.addf %12, %14 : vector<128x128xf32>
    %cst_15 = arith.constant dense<0xFF800000> : vector<128xf32>
    %16 = vector.multi_reduction <maximumf>, %15, %cst_15 [1] : vector<128x128xf32> to vector<128xf32>
    %17 = vector.shape_cast %16 : vector<128xf32> to vector<128x1xf32>
    %18 = vector.broadcast %17 : vector<128x1xf32> to vector<128x128xf32>
    %19 = arith.subf %15, %18 : vector<128x128xf32>
    %20 = math.exp %19 : vector<128x128xf32>
    %cst_16 = arith.constant dense<0.000000e+00> : vector<128xf32>
    %21 = vector.multi_reduction <add>, %20, %cst_16 [1] : vector<128x128xf32> to vector<128xf32>
    %22 = vector.shape_cast %21 : vector<128xf32> to vector<128x1xf32>
    %23 = tpu.reciprocal %22 {approx = true} : vector<128x1xf32> -> vector<128x1xf32>
    %24 = vector.broadcast %23 : vector<128x1xf32> to vector<128x128xf32>
    %25 = arith.mulf %20, %24 : vector<128x128xf32>
    %c0_17 = arith.constant 0 : index
    %c0_18 = arith.constant 0 : index
    %26 = vector.load %arg8[%c0_17, %c0_18] : memref<128x128xf32, #tpu.memory_space<vmem>>, vector<128x128xf32>
    tpu.vector_store %arg8[%c0_17, %c0_18], %25 {strides = array<i32>} : memref<128x128xf32, #tpu.memory_space<vmem>>, vector<128x128xf32>,
    return
  }
  func.func @transform_0(%arg0: i32) -> (i32, i32) {
    %c0_i32 = arith.constant 0 : i32
    %c0_i32_0 = arith.constant 0 : i32
    return %arg0, %c0_i32 : i32, i32
  }
  func.func @transform_1(%arg0: i32) -> (i32, i32) {
    %c0_i32 = arith.constant 0 : i32
    %c0_i32_0 = arith.constant 0 : i32
    return %arg0, %c0_i32 : i32, i32
  }
  func.func @transform_2(%arg0: i32) -> (i32, i32) {
    %c0_i32 = arith.constant 0 : i32
    %c0_i32_0 = arith.constant 0 : i32
    %c0_i32_1 = arith.constant 0 : i32
    return %c0_i32, %c0_i32_0 : i32, i32
  }
  func.func @transform_3(%arg0: i32) -> (i32, i32) {
    %c0_i32 = arith.constant 0 : i32
    %c0_i32_0 = arith.constant 0 : i32
    %c0_i32_1 = arith.constant 0 : i32
    return %c0_i32, %c0_i32_0 : i32, i32
  }
  func.func @transform_4(%arg0: i32) -> (i32, i32) {
    %c0_i32 = arith.constant 0 : i32
    %c0_i32_0 = arith.constant 0 : i32
    %c0_i32_1 = arith.constant 0 : i32
    return %c0_i32, %c0_i32_0 : i32, i32
  }
  func.func @transform_5(%arg0: i32) -> (i32, i32) {
    %c0_i32 = arith.constant 0 : i32
    %c0_i32_0 = arith.constant 0 : i32
    %c0_i32_1 = arith.constant 0 : i32
    return %c0_i32, %c0_i32_0 : i32, i32
  }
  func.func @transform_6(%arg0: i32) -> (i32, i32) {
    %c0_i32 = arith.constant 0 : i32
    %c0_i32_0 = arith.constant 0 : i32
    %c0_i32_1 = arith.constant 0 : i32
    return %c0_i32, %c0_i32_0 : i32, i32
  }
  func.func @transform_7(%arg0: i32) -> (i32, i32) {
    %c0_i32 = arith.constant 0 : i32
    %c0_i32_0 = arith.constant 0 : i32
    return %arg0, %c0_i32 : i32, i32
  }
}

</mosaic_0001>

<bundles_post_ra>
// kernel: decoder_forward.3
= control target key start
LH: loop header
LB: loop body
LE: loop exit
PB: predicated region body
PF: predicated region fallthrough
CT: control target
= control target key end

     0   :  { %s1456_s3 = inlined_call_operand.vmem [shape: bf16[128,128], index: 3, kind: input, shape index: {}]   ;;  %s1457_s1 = inlined_call_operand.vmem [shape: bf16[128,128], index: 1, kind: input, shape index: {}]   ;;  %s1458_s2 = inlined_call_operand.vmem [shape: bf16[128,128], index: 2, kind: input, shape index: {}]   ;;  %s1459_s0 = inlined_call_operand.vmem [shape: bf16[128,128], index: 0, kind: input, shape index: {}]   ;;  %s1460_s5 = inlined_call_operand.vmem [shape: bf16[128,128], index: 5, kind: input, shape index: {}]   ;;  %s1461_s4 = inlined_call_operand.vmem [shape: f32[1,128], index: 4, kind: input, shape index: {}]   ;;  %s1462_s6 = inlined_call_operand.vmem [shape: f32[1,128], index: 6, kind: input, shape index: {}]   ;;  %s1463_s7 = inlined_call_operand.vmem [shape: f32[128,128], index: 7, kind: output, shape index: {}]  }
   0x1   :  { %v1042_v0 = vld [vmem:[%s1456_s3] sm:$0xff]   ;;  %v1043_v1 = vld [vmem:[%s1456_s3 + $0x8] sm:$0xff]   ;;  %v1044_v2 = vld [vmem:[%s1456_s3 + $0x10] sm:$0xff]  }
   0x2   :  { %930 = vmatprep.subr.bf16.mxu0 %v1042_v0  ;;  %v1045_v3 = vld [vmem:[%s1456_s3 + $0x18] sm:$0xff]   ;;  %v1050_v4 = vld [vmem:[%s1457_s1] sm:$0xff]   ;;  %v1047_v6 = vld [vmem:[%s1456_s3 + $0x28] sm:$0xff]  }
   0x3   :  { %931 = vmatpush3.bf16.msra.mxu0 %v1042_v0  ;;  %946 = vmatprep.mubr.bf16.mxu0 %v1050_v4  ;;  %v1046_v5 = vld [vmem:[%s1456_s3 + $0x20] sm:$0xff]   ;;  %v1048_v7 = vld [vmem:[%s1456_s3 + $0x30] sm:$0xff]   ;;  %v1049_v8 = vld [vmem:[%s1456_s3 + $0x38] sm:$0xff]  }
   0x4   :  { %932 = vmatprep.subr.bf16.mxu0 %v1043_v1  ;;  %v1052_v9 = vld [vmem:[%s1458_s2] sm:$0xff]   ;;  %v1051_v10 = vld [vmem:[%s1457_s1 + $0x8] sm:$0xff]   ;;  %v1054_v12 = vld [vmem:[%s1457_s1 + $0x10] sm:$0xff]  }
   0x5   :  { %v1053_v11 = vld [vmem:[%s1458_s2 + $0x8] sm:$0xff]   ;;  %v1074_v13 = vld [vmem:[%s1460_s5] sm:$0xff]   ;;  %v1055_v15 = vld [vmem:[%s1457_s1 + $0x18] sm:$0xff]  }
   0x6   :  { %v1075_v14 = vld [vmem:[%s1460_s5 + $0x8] sm:$0xff]   ;;  %994 = vmatprep.subr.bf16.mxu1 %v1074_v13  ;;  %v1056_v16 = vld [vmem:[%s1458_s2 + $0x10] sm:$0xff]   ;;  %v1058_v18 = vld [vmem:[%s1457_s1 + $0x20] sm:$0xff]  }
   0x7   :  { %933 = vmatpush3.bf16.msra.mxu0 %v1043_v1  ;;  %995 = vmatpush3.bf16.msra.mxu1 %v1074_v13  ;;  %v1076_v17 = vld [vmem:[%s1460_s5 + $0x10] sm:$0xff]   ;;  %v1057_v19 = vld [vmem:[%s1458_s2 + $0x18] sm:$0xff]   ;;  %v1060_v21 = vld [vmem:[%s1458_s2 + $0x20] sm:$0xff]  }
   0x8   :  { %934 = vmatprep.subr.bf16.mxu0 %v1044_v2  ;;  %996 = vmatprep.subr.bf16.mxu1 %v1075_v14  ;;  %v1077_v20 = vld [vmem:[%s1460_s5 + $0x18] sm:$0xff]   ;;  %v1078_v22 = vld [vmem:[%s1460_s5 + $0x20] sm:$0xff]   ;;  %v1059_v23 = vld [vmem:[%s1457_s1 + $0x28] sm:$0xff]  }
   0x9   :  { %v1062_v24 = vld [vmem:[%s1457_s1 + $0x30] sm:$0xff]   ;;  %v1061_v25 = vld [vmem:[%s1458_s2 + $0x28] sm:$0xff]   ;;  %v1063_v28 = vld [vmem:[%s1457_s1 + $0x38] sm:$0xff]  }
   0xa   :  { %v1079_v26 = vld [vmem:[%s1460_s5 + $0x28] sm:$0xff]   ;;  %v1064_v27 = vld [vmem:[%s1458_s2 + $0x30] sm:$0xff]   ;;  %v1066_v29 = vld [vmem:[%s1459_s0] sm:$0xff]  }
   0xb   :  { %935 = vmatpush3.bf16.msra.mxu0 %v1044_v2  ;;  %997 = vmatpush3.bf16.msra.mxu1 %v1075_v14  ;;  %v1065_v30 = vld [vmem:[%s1458_s2 + $0x38] sm:$0xff]   ;;  %v1067_v31 = vld [vmem:[%s1459_s0 + $0x8] sm:$0xff]   ;;  %v1068_v32 = vld [vmem:[%s1459_s0 + $0x10] sm:$0xff]  }
   0xc   :  { %936 = vmatprep.subr.bf16.mxu0 %v1045_v3  ;;  %998 = vmatprep.subr.bf16.mxu1 %v1076_v17  ;;  %v1069_v33 = vld [vmem:[%s1459_s0 + $0x18] sm:$0xff]   ;;  %v1070_v34 = vld [vmem:[%s1459_s0 + $0x20] sm:$0xff]   ;;  %v1071_v35 = vld [vmem:[%s1459_s0 + $0x28] sm:$0xff]  }
   0xd   :  { %v1072_v36 = vld [vmem:[%s1459_s0 + $0x30] sm:$0xff]   ;;  %v1073_v37 = vld [vmem:[%s1459_s0 + $0x38] sm:$0xff]   ;;  %v872_v41 = vld [vmem:[%s1461_s4] ss:$0 sm:$0xff] }
   0xe   :  { %v1080_v38 = vld [vmem:[%s1460_s5 + $0x30] sm:$0xff]   ;;  %v1081_v39 = vld [vmem:[%s1460_s5 + $0x38] sm:$0xff]  }
   0xf   :  { %937 = vmatpush3.bf16.msra.mxu0 %v1045_v3  ;;  %999 = vmatpush3.bf16.msra.mxu1 %v1076_v17  ;;  %v873_v17 = vld [vmem:[%s1462_s6] ss:$0 sm:$0xff] }
  0x10   :  { %938 = vmatprep.subr.bf16.mxu0 %v1046_v5  ;;  %1000 = vmatprep.subr.bf16.mxu1 %v1077_v20 }
  0x13   :  { %939 = vmatpush3.bf16.msra.mxu0 %v1046_v5  ;;  %1001 = vmatpush3.bf16.msra.mxu1 %v1077_v20 }
  0x14   :  { %940 = vmatprep.subr.bf16.mxu0 %v1047_v6  ;;  %1002 = vmatprep.subr.bf16.mxu1 %v1078_v22 }
  0x17   :  { %941 = vmatpush3.bf16.msra.mxu0 %v1047_v6  ;;  %1003 = vmatpush3.bf16.msra.mxu1 %v1078_v22 }
  0x18   :  { %942 = vmatprep.subr.bf16.mxu0 %v1048_v7  ;;  %1004 = vmatprep.subr.bf16.mxu1 %v1079_v26 }
  0x1b   :  { %943 = vmatpush3.bf16.msra.mxu0 %v1048_v7  ;;  %1005 = vmatpush3.bf16.msra.mxu1 %v1079_v26 }
  0x1c   :  { %944 = vmatprep.subr.bf16.mxu0 %v1049_v8  ;;  %1006 = vmatprep.subr.bf16.mxu1 %v1080_v38 }
  0x1f   :  { %945 = vmatpush3.bf16.msra.mxu0 %v1049_v8  ;;  %1007 = vmatpush3.bf16.msra.mxu1 %v1080_v38 }
  0x20   :  { %962 = vmatprep.subr.bf16.mxu0 %v1052_v9  ;;  %1008 = vmatprep.subr.bf16.mxu1 %v1081_v39 }
  0x22   :  { %947 = vmatmul.mubr.bf16.vlgmr.msra.gmra.mrb[0].mxu0 %v1051_v10 }
  0x23   :  { %963 = vmatpush3.bf16.msra.mxu0 %v1052_v9  ;;  %950 = vmatprep.mubr.bf16.mxu0 %v1054_v12 }
  0x24   :  { %964 = vmatprep.subr.bf16.mxu0 %v1053_v11  ;;  %1009 = vmatpush3.bf16.msra.mxu1 %v1081_v39 }
  0x27   :  { %965 = vmatpush3.bf16.msra.mxu0 %v1053_v11 }
  0x28   :  { %966 = vmatprep.subr.bf16.mxu0 %v1056_v16 }
  0x2a   :  { %951 = vmatmul.mubr.bf16.gmra.mrb[4].mxu0 %v1055_v15 }
  0x2b   :  { %967 = vmatpush3.bf16.msra.mxu0 %v1056_v16  ;;  %954 = vmatprep.mubr.bf16.mxu0 %v1058_v18 }
  0x2c   :  { %968 = vmatprep.subr.bf16.mxu0 %v1057_v19 }
  0x2f   :  { %969 = vmatpush3.bf16.msra.mxu0 %v1057_v19 }
  0x30   :  { %970 = vmatprep.subr.bf16.mxu0 %v1060_v21 }
  0x32   :  { %955 = vmatmul.mubr.bf16.gmra.mrb[8].mxu0 %v1059_v23 }
  0x33   :  { %971 = vmatpush3.bf16.msra.mxu0 %v1060_v21  ;;  %958 = vmatprep.mubr.bf16.mxu0 %v1062_v24 }
  0x34   :  { %972 = vmatprep.subr.bf16.mxu0 %v1061_v25 }
  0x37   :  { %973 = vmatpush3.bf16.msra.mxu0 %v1061_v25 }
  0x38   :  { %974 = vmatprep.subr.bf16.mxu0 %v1064_v27 }
  0x3a   :  { %959 = vmatmul.mubr.bf16.gmra.mrb[12].mxu0 %v1063_v28 }
  0x3b   :  { %975 = vmatpush3.bf16.msra.mxu0 %v1064_v27  ;;  %978 = vmatprep.mubr.bf16.mxu0 %v1066_v29 }
  0x3c   :  { %976 = vmatprep.subr.bf16.mxu0 %v1065_v30 }
  0x3f   :  { %977 = vmatpush3.bf16.msra.mxu0 %v1065_v30 }
  0x42   :  { %979 = vmatmul.mubr.bf16.vlgmr.msra.gmra.mrb[0].mxu0 %v1067_v31 }
  0x43   :  { %982 = vmatprep.mubr.bf16.mxu0 %v1068_v32 }
  0x4a   :  { %983 = vmatmul.mubr.bf16.gmra.mrb[4].mxu0 %v1069_v33 }
  0x4b   :  { %986 = vmatprep.mubr.bf16.mxu0 %v1070_v34 }
  0x52   :  { %987 = vmatmul.mubr.bf16.gmra.mrb[8].mxu0 %v1071_v35 }
  0x53   :  { %990 = vmatprep.mubr.bf16.mxu0 %v1072_v36 }
  0x5a   :  { %991 = vmatmul.mubr.bf16.gmra.mrb[12].mxu0 %v1073_v37 }
 0x115   :  { %v980_v40 = vpop.f32.mrb[0].mxu0 }
 0x116   :  { %v414_v42 = vpop.f32.mrb[1].mxu0  ;;  %v486_v44 = vadd.f32 %v980_v40, %v872_v41 }
 0x117   :  { %v981_v43 = vpop.f32.mrb[2].mxu0  ;;  %v484_v47 = vadd.f32 %v872_v41, %v414_v42 }
 0x118   :  { %v487_v45 = vadd.f32 %v981_v43, %v872_v41  ;;  %v417_v46 = vpop.f32.mrb[3].mxu0 }
 0x119   :  { %v485_v48 = vadd.f32 %v872_v41, %v417_v46 }
 0x11a   :  { %v501_v49 = vpack.c.bf16 %v487_v45, %v486_v44 }
 0x11b   :  { %v500_v50 = vpack.c.bf16 %v485_v48, %v484_v47 }
 0x11d   :  { %v984_v51 = vpop.f32.mrb[4].mxu0  ;;  %1010 = vmatprep.mubr.bf16.mxu1 %v500_v50 }
 0x11e   :  { %v430_v52 = vpop.f32.mrb[5].mxu0  ;;  %1011 = vmatmul.mubr.bf16.vlgmr.msra.gmra.mrb[0].mxu1 %v501_v49  ;;  %v490_v54 = vadd.f32 %v984_v51, %v872_v41 }
 0x11f   :  { %v985_v53 = vpop.f32.mrb[6].mxu0  ;;  %v488_v57 = vadd.f32 %v872_v41, %v430_v52 }
 0x120   :  { %v491_v55 = vadd.f32 %v985_v53, %v872_v41  ;;  %v433_v56 = vpop.f32.mrb[7].mxu0 }
 0x121   :  { %v489_v58 = vadd.f32 %v872_v41, %v433_v56 }
 0x122   :  { %v503_v59 = vpack.c.bf16 %v491_v55, %v490_v54 }
 0x123   :  { %v502_v60 = vpack.c.bf16 %v489_v58, %v488_v57 }
 0x125   :  { %v988_v61 = vpop.f32.mrb[8].mxu0  ;;  %1014 = vmatprep.mubr.bf16.mxu1 %v502_v60 }
 0x126   :  { %v446_v62 = vpop.f32.mrb[9].mxu0  ;;  %1015 = vmatmul.mubr.bf16.gmra.mrb[4].mxu1 %v503_v59  ;;  %v494_v0 = vadd.f32 %v988_v61, %v872_v41 }
 0x127   :  { %v989_v63 = vpop.f32.mrb[10].mxu0  ;;  %v492_v3 = vadd.f32 %v872_v41, %v446_v62 }
 0x128   :  { %v495_v1 = vadd.f32 %v989_v63, %v872_v41  ;;  %v449_v2 = vpop.f32.mrb[11].mxu0 }
 0x129   :  { %v493_v4 = vadd.f32 %v872_v41, %v449_v2 }
 0x12a   :  { %v505_v5 = vpack.c.bf16 %v495_v1, %v494_v0 }
 0x12b   :  { %v504_v6 = vpack.c.bf16 %v493_v4, %v492_v3 }
 0x12d   :  { %v992_v7 = vpop.f32.mrb[12].mxu0  ;;  %1018 = vmatprep.mubr.bf16.mxu1 %v504_v6 }
 0x12e   :  { %v462_v8 = vpop.f32.mrb[13].mxu0  ;;  %1019 = vmatmul.mubr.bf16.gmra.mrb[8].mxu1 %v505_v5  ;;  %v498_v10 = vadd.f32 %v992_v7, %v872_v41 }
 0x12f   :  { %v993_v9 = vpop.f32.mrb[14].mxu0  ;;  %v496_v13 = vadd.f32 %v872_v41, %v462_v8 }
 0x130   :  { %v499_v11 = vadd.f32 %v993_v9, %v872_v41  ;;  %v465_v12 = vpop.f32.mrb[15].mxu0 }
 0x131   :  { %v497_v14 = vadd.f32 %v872_v41, %v465_v12 }
 0x132   :  { %v507_v15 = vpack.c.bf16 %v499_v11, %v498_v10 }
 0x133   :  { %v506_v16 = vpack.c.bf16 %v497_v14, %v496_v13 }
 0x135   :  { %1022 = vmatprep.mubr.bf16.mxu1 %v506_v16 }
 0x136   :  { %1023 = vmatmul.mubr.bf16.gmra.mrb[12].mxu1 %v507_v15 }
 0x1f1   :  { %v1012_v18 = vpop.f32.mrb[0].mxu1 }
 0x1f2   :  { %v622_v19 = vadd.f32 %v1012_v18, %v873_v17  ;;  %v613_v20 = vpop.f32.mrb[1].mxu1 }
 0x1f3   :  { %v614_v21 = vadd.f32 %v873_v17, %v613_v20  ;;  %v1013_v22 = vpop.f32.mrb[2].mxu1 }
 0x1f4   :  { %680 = vmax.xlane.f32.xlu1 %v622_v19  ;;  %v616_v23 = vpop.f32.mrb[3].mxu1  ;;  %v625_v24 = vadd.f32 %v1013_v22, %v873_v17 }
 0x1f5   :  { %676 = vmax.xlane.f32.xlu0 %v614_v21  ;;  %v617_v25 = vadd.f32 %v873_v17, %v616_v23 }
 0x1f8   :  { %682 = vmax.xlane.f32.xlu1 %v625_v24 }
 0x1f9   :  { %678 = vmax.xlane.f32.xlu0 %v617_v25  ;;  %v1016_v26 = vpop.f32.mrb[4].mxu1 }
 0x1fa   :  { %v638_v27 = vadd.f32 %v1016_v26, %v873_v17  ;;  %v629_v28 = vpop.f32.mrb[5].mxu1 }
 0x1fb   :  { %v1017_v29 = vpop.f32.mrb[6].mxu1  ;;  %v630_v32 = vadd.f32 %v873_v17, %v629_v28 }
 0x1fc   :  { %v641_v30 = vadd.f32 %v1017_v29, %v873_v17  ;;  %v632_v31 = vpop.f32.mrb[7].mxu1 }
 0x1fd   :  { %688 = vmax.xlane.f32.xlu0 %v638_v27  ;;  %v633_v33 = vadd.f32 %v873_v17, %v632_v31 }
 0x1fe   :  { %690 = vmax.xlane.f32.xlu1 %v641_v30 }
 0x201   :  { %684 = vmax.xlane.f32.xlu0 %v630_v32  ;;  %v1020_v34 = vpop.f32.mrb[8].mxu1 }
 0x202   :  { %v1312_v35 = vadd.f32 %v1020_v34, %v873_v17  ;;  %686 = vmax.xlane.f32.xlu1 %v633_v33  ;;  %v645_v36 = vpop.f32.mrb[9].mxu1 }
 0x203   :  { %v1021_v37 = vpop.f32.mrb[10].mxu1  ;;  %v1318_v40 = vadd.f32 %v873_v17, %v645_v36 }
 0x204   :  { %v1314_v38 = vadd.f32 %v1021_v37, %v873_v17  ;;  %v648_v39 = vpop.f32.mrb[11].mxu1 }
 0x205   :  { %696 = vmax.xlane.f32.xlu0 %v1312_v35  ;;  %v1320_v41 = vadd.f32 %v873_v17, %v648_v39 }
 0x206   :  { %698 = vmax.xlane.f32.xlu1 %v1314_v38 }
 0x209   :  { %692 = vmax.xlane.f32.xlu0 %v1318_v40  ;;  %v1024_v42 = vpop.f32.mrb[12].mxu1 }
 0x20a   :  { %694 = vmax.xlane.f32.xlu1 %v1320_v41  ;;  %v661_v43 = vpop.f32.mrb[13].mxu1  ;;  %v1329_v48 = vadd.f32 %v1024_v42, %v873_v17 }
 0x20b   :  { %v1324_v44 = vadd.f32 %v873_v17, %v661_v43  ;;  %v1025_v45 = vpop.f32.mrb[14].mxu1 }
 0x20c   :  { %v664_v46 = vpop.f32.mrb[15].mxu1  ;;  %v1332_v49 = vadd.f32 %v1025_v45, %v873_v17 }
 0x20d   :  { %v1326_v47 = vadd.f32 %v873_v17, %v664_v46  ;;  %700 = vmax.xlane.f32.xlu0 %v1324_v44 }
 0x20f   :  { %702 = vmax.xlane.f32.xlu1 %v1326_v47 }
 0x211   :  { %704 = vmax.xlane.f32.xlu0 %v1329_v48 }
 0x213   :  { %706 = vmax.xlane.f32.xlu1 %v1332_v49 }
 0x281   :  { %v681_v50 = vpop.xlane.xlu1 %680 }
 0x282   :  { %v710_v51 = vsub.f32 %v622_v19, %v681_v50  ;;  %v677_v52 = vpop.xlane.xlu0 %676 }
 0x283   :  { %v708_v53 = vsub.f32 %v614_v21, %v677_v52 }
 0x284   :  { %v728_v54 = vmul.f32 1.442695, %v710_v51 }
 0x285   :  { %v724_v55 = vmul.f32 1.442695, %v708_v53  ;;  %v683_v56 = vpop.xlane.xlu1 %682 }
 0x286   :  { %1082 = vpow2.f32 %v728_v54  ;;  %v711_v57 = vsub.f32 %v625_v24, %v683_v56  ;;  %v679_v58 = vpop.xlane.xlu0 %678 }
 0x287   :  { %v709_v59 = vsub.f32 %v617_v25, %v679_v58  ;;  %1084 = vpow2.f32 %v724_v55 }
 0x288   :  { %v730_v60 = vmul.f32 1.442695, %v711_v57 }
 0x289   :  { %v726_v61 = vmul.f32 1.442695, %v709_v59 }
 0x28a   :  { %1086 = vpow2.f32 %v730_v60  ;;  %v689_v62 = vpop.xlane.xlu0 %688 }
 0x28b   :  { %v714_v63 = vsub.f32 %v638_v27, %v689_v62  ;;  %v691_v0 = vpop.xlane.xlu1 %690  ;;  %1088 = vpow2.f32 %v726_v61 }
 0x28c   :  { %v715_v1 = vsub.f32 %v641_v30, %v691_v0 }
 0x28d   :  { %v736_v2 = vmul.f32 1.442695, %v714_v63 }
 0x28e   :  { %v738_v3 = vmul.f32 1.442695, %v715_v1  ;;  %v685_v4 = vpop.xlane.xlu0 %684 }
 0x28f   :  { %1090 = vpow2.f32 %v736_v2  ;;  %v712_v5 = vsub.f32 %v630_v32, %v685_v4  ;;  %v687_v6 = vpop.xlane.xlu1 %686 }
 0x290   :  { %v1336_v7 = vpop.eup %1082  ;;  %v713_v8 = vsub.f32 %v633_v33, %v687_v6  ;;  %1092 = vpow2.f32 %v738_v3 }
 0x291   :  { %v732_v9 = vmul.f32 1.442695, %v712_v5  ;;  %760 = vadd.xlane.f32.xlu0 %v1336_v7  ;;  %v1339_v12 = vpop.eup %1084 }
 0x292   :  { %v734_v10 = vmul.f32 1.442695, %v713_v8  ;;  %v697_v11 = vpop.xlane.xlu0 %696 }
 0x293   :  { %1094 = vpow2.f32 %v732_v9  ;;  %v718_v13 = vsub.f32 %v1312_v35, %v697_v11  ;;  %v699_v14 = vpop.xlane.xlu1 %698 }
 0x294   :  { %v1342_v15 = vpop.eup %1086  ;;  %v719_v16 = vsub.f32 %v1314_v38, %v699_v14  ;;  %1096 = vpow2.f32 %v734_v10 }
 0x295   :  { %v744_v17 = vmul.f32 1.442695, %v718_v13  ;;  %762 = vadd.xlane.f32.xlu1 %v1342_v15  ;;  %756 = vadd.xlane.f32.xlu0 %v1339_v12  ;;  %v1348_v22 = vpop.eup %1088 }
 0x296   :  { %v746_v18 = vmul.f32 1.442695, %v719_v16  ;;  %v693_v19 = vpop.xlane.xlu0 %692 }
 0x297   :  { %1098 = vpow2.f32 %v744_v17  ;;  %v716_v20 = vsub.f32 %v1318_v40, %v693_v19  ;;  %v695_v21 = vpop.xlane.xlu1 %694 }
 0x298   :  { %v717_v23 = vsub.f32 %v1320_v41, %v695_v21  ;;  %1100 = vpow2.f32 %v746_v18 }
 0x299   :  { %v1351_v24 = vpop.eup %1090  ;;  %v740_v25 = vmul.f32 1.442695, %v716_v20  ;;  %758 = vadd.xlane.f32.xlu1 %v1348_v22 }
 0x29a   :  { %v742_v26 = vmul.f32 1.442695, %v717_v23  ;;  %768 = vadd.xlane.f32.xlu0 %v1351_v24  ;;  %v701_v27 = vpop.xlane.xlu0 %700  ;;  %v1356_v29 = vpop.eup %1092 }
 0x29b   :  { %1102 = vpow2.f32 %v740_v25  ;;  %v720_v28 = vsub.f32 %v1324_v44, %v701_v27 }
 0x29c   :  { %v703_v30 = vpop.xlane.xlu1 %702  ;;  %1104 = vpow2.f32 %v742_v26 }
 0x29d   :  { %v1358_v31 = vpop.eup %1094  ;;  %v748_v32 = vmul.f32 1.442695, %v720_v28  ;;  %v721_v33 = vsub.f32 %v1326_v47, %v703_v30  ;;  %770 = vadd.xlane.f32.xlu1 %v1356_v29 }
 0x29e   :  { %764 = vadd.xlane.f32.xlu0 %v1358_v31  ;;  %v705_v34 = vpop.xlane.xlu0 %704  ;;  %v1364_v37 = vpop.eup %1096 }
 0x29f   :  { %1106 = vpow2.f32 %v748_v32  ;;  %v750_v35 = vmul.f32 1.442695, %v721_v33  ;;  %v722_v36 = vsub.f32 %v1329_v48, %v705_v34 }
 0x2a0   :  { %v707_v38 = vpop.xlane.xlu1 %706 }
 0x2a1   :  { %v1366_v39 = vpop.eup %1098  ;;  %1108 = vpow2.f32 %v750_v35  ;;  %v752_v40 = vmul.f32 1.442695, %v722_v36  ;;  %v723_v41 = vsub.f32 %v1332_v49, %v707_v38  ;;  %766 = vadd.xlane.f32.xlu1 %v1364_v37 }
 0x2a2   :  { %776 = vadd.xlane.f32.xlu0 %v1366_v39  ;;  %v1371_v43 = vpop.eup %1100 }
 0x2a3   :  { %1110 = vpow2.f32 %v752_v40  ;;  %v754_v42 = vmul.f32 1.442695, %v723_v41 }
 0x2a5   :  { %v1373_v44 = vpop.eup %1102  ;;  %1112 = vpow2.f32 %v754_v42  ;;  %778 = vadd.xlane.f32.xlu1 %v1371_v43 }
 0x2a6   :  { %772 = vadd.xlane.f32.xlu0 %v1373_v44  ;;  %v1377_v45 = vpop.eup %1104 }
 0x2a9   :  { %v1379_v46 = vpop.eup %1106  ;;  %774 = vadd.xlane.f32.xlu1 %v1377_v45 }
 0x2aa   :  { %780 = vadd.xlane.f32.xlu0 %v1379_v46 }
 0x2ab   :  { %v1383_v47 = vpop.eup %1108 }
 0x2ad   :  { %v1385_v48 = vpop.eup %1110  ;;  %782 = vadd.xlane.f32.xlu1 %v1383_v47 }
 0x2ae   :  { %784 = vadd.xlane.f32.xlu0 %v1385_v48 }
 0x2af   :  { %v1389_v49 = vpop.eup %1112 }
 0x2b1   :  { %786 = vadd.xlane.f32.xlu1 %v1389_v49 }
 0x31e   :  { %v761_v50 = vpop.xlane.xlu0 %760 }
 0x31f   :  { %1114 = vrcp.f32 %v761_v50 }
 0x322   :  { %v763_v51 = vpop.xlane.xlu1 %762  ;;  %v757_v52 = vpop.xlane.xlu0 %756 }
 0x323   :  { %1116 = vrcp.f32 %v763_v51 }
 0x324   :  { %1118 = vrcp.f32 %v757_v52 }
 0x326   :  { %v759_v53 = vpop.xlane.xlu1 %758 }
 0x327   :  { %1120 = vrcp.f32 %v759_v53  ;;  %v769_v54 = vpop.xlane.xlu0 %768 }
 0x328   :  { %1122 = vrcp.f32 %v769_v54 }
 0x329   :  { %v1115_v55 = vpop.eup %1114 }
 0x32a   :  { %v806_v56 = vmul.f32 %v1115_v55, %v1336_v7  ;;  %v771_v57 = vpop.xlane.xlu1 %770 }
 0x32b   :  { %1124 = vrcp.f32 %v771_v57  ;;  %v765_v58 = vpop.xlane.xlu0 %764 }
 0x32c   :  { %822 = vst [vmem:[%s1463_s7 + $0x10] sm:$0xff] %v806_v56  ;;  %1126 = vrcp.f32 %v765_v58 }
 0x32d   :  { %v1117_v59 = vpop.eup %1116 }
 0x32e   :  { %v1119_v60 = vpop.eup %1118  ;;  %v807_v61 = vmul.f32 %v1117_v59, %v1342_v15  ;;  %v767_v62 = vpop.xlane.xlu1 %766 }
 0x32f   :  { %v804_v63 = vmul.f32 %v1119_v60, %v1339_v12  ;;  %1128 = vrcp.f32 %v767_v62  ;;  %v777_v0 = vpop.xlane.xlu0 %776 }
 0x330   :  { %823 = vst [vmem:[%s1463_s7 + $0x18] sm:$0xff] %v807_v61  ;;  %1130 = vrcp.f32 %v777_v0 }
 0x331   :  { %v1121_v1 = vpop.eup %1120  ;;  %820 = vst [vmem:[%s1463_s7] sm:$0xff] %v804_v63 }
 0x332   :  { %v1123_v2 = vpop.eup %1122  ;;  %v805_v3 = vmul.f32 %v1121_v1, %v1348_v22  ;;  %v779_v4 = vpop.xlane.xlu1 %778 }
 0x333   :  { %v810_v5 = vmul.f32 %v1123_v2, %v1351_v24  ;;  %1132 = vrcp.f32 %v779_v4  ;;  %v773_v6 = vpop.xlane.xlu0 %772 }
 0x334   :  { %821 = vst [vmem:[%s1463_s7 + $0x8] sm:$0xff] %v805_v3  ;;  %1134 = vrcp.f32 %v773_v6 }
 0x335   :  { %v1125_v7 = vpop.eup %1124  ;;  %826 = vst [vmem:[%s1463_s7 + $0x30] sm:$0xff] %v810_v5 }
 0x336   :  { %v1127_v8 = vpop.eup %1126  ;;  %v811_v9 = vmul.f32 %v1125_v7, %v1356_v29  ;;  %v775_v10 = vpop.xlane.xlu1 %774 }
 0x337   :  { %v808_v11 = vmul.f32 %v1127_v8, %v1358_v31  ;;  %1136 = vrcp.f32 %v775_v10  ;;  %v781_v12 = vpop.xlane.xlu0 %780 }
 0x338   :  { %827 = vst [vmem:[%s1463_s7 + $0x38] sm:$0xff] %v811_v9  ;;  %1138 = vrcp.f32 %v781_v12 }
 0x339   :  { %v1129_v13 = vpop.eup %1128  ;;  %824 = vst [vmem:[%s1463_s7 + $0x20] sm:$0xff] %v808_v11 }
 0x33a   :  { %v1131_v14 = vpop.eup %1130  ;;  %v809_v15 = vmul.f32 %v1129_v13, %v1364_v37  ;;  %v783_v16 = vpop.xlane.xlu1 %782 }
 0x33b   :  { %v814_v17 = vmul.f32 %v1131_v14, %v1366_v39  ;;  %1140 = vrcp.f32 %v783_v16  ;;  %v785_v18 = vpop.xlane.xlu0 %784 }
 0x33c   :  { %825 = vst [vmem:[%s1463_s7 + $0x28] sm:$0xff] %v809_v15  ;;  %1142 = vrcp.f32 %v785_v18 }
 0x33d   :  { %v1133_v19 = vpop.eup %1132  ;;  %830 = vst [vmem:[%s1463_s7 + $0x50] sm:$0xff] %v814_v17 }
 0x33e   :  { %v1135_v20 = vpop.eup %1134  ;;  %v815_v21 = vmul.f32 %v1133_v19, %v1371_v43  ;;  %v787_v22 = vpop.xlane.xlu1 %786 }
 0x33f   :  { %v812_v23 = vmul.f32 %v1135_v20, %v1373_v44  ;;  %1144 = vrcp.f32 %v787_v22 }
 0x340   :  { %831 = vst [vmem:[%s1463_s7 + $0x58] sm:$0xff] %v815_v21 }
 0x341   :  { %v1137_v24 = vpop.eup %1136  ;;  %828 = vst [vmem:[%s1463_s7 + $0x40] sm:$0xff] %v812_v23 }
 0x342   :  { %v1139_v25 = vpop.eup %1138  ;;  %v813_v26 = vmul.f32 %v1137_v24, %v1377_v45 }
 0x343   :  { %v816_v27 = vmul.f32 %v1139_v25, %v1379_v46 }
 0x344   :  { %829 = vst [vmem:[%s1463_s7 + $0x48] sm:$0xff] %v813_v26 }
 0x345   :  { %v1141_v28 = vpop.eup %1140  ;;  %832 = vst [vmem:[%s1463_s7 + $0x60] sm:$0xff] %v816_v27 }
 0x346   :  { %v1143_v29 = vpop.eup %1142  ;;  %v817_v30 = vmul.f32 %v1141_v28, %v1383_v47 }
 0x347   :  { %v818_v31 = vmul.f32 %v1143_v29, %v1385_v48 }
 0x348   :  { %833 = vst [vmem:[%s1463_s7 + $0x68] sm:$0xff] %v817_v30 }
 0x349   :  { %v1145_v32 = vpop.eup %1144  ;;  %834 = vst [vmem:[%s1463_s7 + $0x70] sm:$0xff] %v818_v31 }
 0x34a   :  { %v819_v33 = vmul.f32 %v1145_v32, %v1389_v49 }
 0x34c   :  { %835 = vst [vmem:[%s1463_s7 + $0x78] sm:$0xff] %v819_v33 }

// kernel: decoder_forward.2
= control target key start
LH: loop header
LB: loop body
LE: loop exit
PB: predicated region body
PF: predicated region fallthrough
CT: control target
= control target key end

     0   :  { %15 = vsyncpa [#allocation5], 0  ;;  %s1883_s0 = inlined_call_operand.vmem [shape: s32[24], index: 0, kind: input, shape index: {}]   ;;  %s1884_s1 = inlined_call_operand.vmem [shape: f32[50,128], index: 1, kind: input, shape index: {}]   ;;  %s1885_s2 = inlined_call_operand.vmem [shape: bf16[128,512], index: 2, kind: input, shape index: {}]   ;;  %s1886_s3 = inlined_call_operand.vmem [shape: bf16[128,512], index: 3, kind: input, shape index: {}]   ;;  %s1887_s4 = inlined_call_operand.vmem [shape: f32[1,512], index: 4, kind: input, shape index: {}]   ;;  %s1888_s5 = inlined_call_operand.vmem [shape: f32[8,128], index: 5, kind: input, shape index: {}]   ;;  %s1889_s6 = inlined_call_operand.vmem [shape: f32[8,128], index: 6, kind: input, shape index: {}]   ;;  %s1890_s7 = inlined_call_operand.vmem [shape: bf16[128,128], index: 7, kind: output, shape index: {0}]   ;;  %s1891_s8 = inlined_call_operand.vmem [shape: f32[8,128], index: 8, kind: output, shape index: {1}]   ;;  %s1892_s9 = inlined_call_operand.vmem [shape: f32[8,128], index: 9, kind: output, shape index: {2}]  }
   0x1   :  { %s22_s11 = sshll.u32 %s1883_s0, 4  ;;  %s23_s11 = int_to_ptr.vmem [resolvable:$true] %s22_s11 }
   0x2   :  { %s1360_s12 = scalar_lea.vmem %s23_s11, 16  ;;  %p1365_p1 = scmp.lt.s32.totalorder %s23_s11, %s23_s11 }
   0x3   :  { %p1361_p0 = scmp.ne.s32.totalorder %s23_s11, %s1360_s12  ;;  %p1366_p2 = scmp.lt.s32.totalorder %s1360_s12, %s1360_s12 }
   0x5   :  { %p1367_p3 = por %p1366_p2, %p1365_p1 }
   0x7   :  { %p1368_p4 = pnand %p1367_p3, %p1361_p0 }
   0x9   :  { %1371 = shalt.err (!%p1368_p4)
}
   0xa   :  { %s1382_s13 = smov [#allocation4]  }
   0xb   :  { %25 = dma.vmem_to_smem %s23_s11, 16, %s1382_s13, [#allocation5]  }
   0xc   :  { %1376 = dma.done.wait [#allocation5], 16  }
   0xd   :  { %1377 = vsyncadd [#allocation5], 4294967280 }
   0xe   :  { %41 = sfence }
   0xf   :  { %s1378_s14 = smov 0  }
  0x10 LB: > { %s49_s15 = sld [smem:[#allocation4 + %s1380_s14]]  ;;  %s52_s18 = scalar_lea.vmem [#allocation2], %s1380_s14  ;;  %s1380_s14 = sphi %s1378_s14, %s48_s14  }
  0x11   : > { %s48_s14 = sadd.s32 1, %s1380_s14  }
  0x12   : > { %p45_p5 = scmp.ge.s32.totalorder %s48_s14, 24  }
  0x13   :  { %v1216_v1 = vld [vmem:[%s1885_s2 + $0x4] ss:$16 sps:$4 sm:$0xff] (%p45_p5)   ;;  %v1218_v2 = vld [vmem:[%s1885_s2 + $0xc] ss:$16 sps:$4 sm:$0xff] (%p45_p5)   ;;  %v1383_v3 = vmov (%p45_p5), 0  }
  0x14   :  { %47 = sbr.rel (!%p45_p5) target bundleno = 16 (0x10), region = 79  ;;  %305 = vmatprep.mubr.bf16.mxu0 (%p45_p5), %v1383_v3  ;;  %356 = vmatprep.mubr.bf16.mxu1 (%p45_p5), %v1383_v3  ;;  %v1220_v4 = vld [vmem:[%s1885_s2] ss:$16 sps:$4 sm:$0xff] (%p45_p5)   ;;  %v1221_v5 = vld [vmem:[%s1885_s2 + $0x8] ss:$16 sps:$4 sm:$0xff] (%p45_p5)  }
  0x15   :  { %273 = vmatprep.subr.bf16.mxu0 (%p45_p5), %v1216_v1  ;;  %324 = vmatprep.subr.bf16.mxu1 (%p45_p5), %v1218_v2  ;;  %v1222_v6 = vld [vmem:[%s1885_s2 + $0x24] ss:$16 sps:$4 sm:$0xff] (%p45_p5)   ;;  %v1224_v7 = vld [vmem:[%s1885_s2 + $0x2c] ss:$16 sps:$4 sm:$0xff] (%p45_p5)   ;;  %v1226_v8 = vld [vmem:[%s1885_s2 + $0x20] ss:$16 sps:$4 sm:$0xff] (%p45_p5)  }
  0x16   : > { %s50_s17 = scalar_lea.vmem %s1884_s1, %s49_s15  ;;  %274 = vmatpush1.bf16.msra.mxu0 (%p45_p5), %v1220_v4  ;;  %325 = vmatpush1.bf16.msra.mxu1 (%p45_p5), %v1221_v5  ;;  %v1227_v9 = vld [vmem:[%s1885_s2 + $0x28] ss:$16 sps:$4 sm:$0xff] (%p45_p5)   ;;  %v1228_v10 = vld [vmem:[%s1885_s2 + $0x44] ss:$16 sps:$4 sm:$0xff] (%p45_p5)   ;;  %v1230_v11 = vld [vmem:[%s1885_s2 + $0x4c] ss:$16 sps:$4 sm:$0xff] (%p45_p5)  }
  0x17   : > { %v51_v0 = vld [vmem:[%s50_s17] sm:$0x1]  ;;  %275 = vmatprep.subr.bf16.mxu0 (%p45_p5), %v1222_v6  ;;  %326 = vmatprep.subr.bf16.mxu1 (%p45_p5), %v1224_v7  ;;  %v1233_v13 = vld [vmem:[%s1885_s2 + $0x48] ss:$16 sps:$4 sm:$0xff] (%p45_p5)   ;;  %v1234_v14 = vld [vmem:[%s1885_s2 + $0x64] ss:$16 sps:$4 sm:$0xff] (%p45_p5)  }
  0x18   : > { %53 = vst [vmem:[%s52_s18] sm:$0x1] %v51_v0  ;;  %v1232_v12 = vld [vmem:[%s1885_s2 + $0x40] ss:$16 sps:$4 sm:$0xff] (%p45_p5)   ;;  %v1236_v15 = vld [vmem:[%s1885_s2 + $0x6c] ss:$16 sps:$4 sm:$0xff] (%p45_p5)  }
  0x19   :  { %v1238_v16 = vld [vmem:[%s1885_s2 + $0x60] ss:$16 sps:$4 sm:$0xff] (%p45_p5)   ;;  %v1239_v17 = vld [vmem:[%s1885_s2 + $0x68] ss:$16 sps:$4 sm:$0xff] (%p45_p5)   ;;  %v1240_v18 = vld [vmem:[%s1885_s2 + $0x84] ss:$16 sps:$4 sm:$0xff] (%p45_p5)  }
  0x1a   :  { %276 = vmatpush1.bf16.msra.mxu0 (%p45_p5), %v1226_v8  ;;  %327 = vmatpush1.bf16.msra.mxu1 (%p45_p5), %v1227_v9  ;;  %v1242_v19 = vld [vmem:[%s1885_s2 + $0x8c] ss:$16 sps:$4 sm:$0xff] (%p45_p5)   ;;  %v1244_v20 = vld [vmem:[%s1885_s2 + $0x80] ss:$16 sps:$4 sm:$0xff] (%p45_p5)   ;;  %v1245_v21 = vld [vmem:[%s1885_s2 + $0x88] ss:$16 sps:$4 sm:$0xff] (%p45_p5)  }
  0x1b   :  { %277 = vmatprep.subr.bf16.mxu0 %v1228_v10  ;;  %328 = vmatprep.subr.bf16.mxu1 %v1230_v11  ;;  %v1246_v22 = vld [vmem:[%s1885_s2 + $0xa4] ss:$16 sps:$4 sm:$0xff]   ;;  %v1248_v23 = vld [vmem:[%s1885_s2 + $0xac] ss:$16 sps:$4 sm:$0xff]   ;;  %v1250_v24 = vld [vmem:[%s1885_s2 + $0xa0] ss:$16 sps:$4 sm:$0xff]  }
  0x1c   :  { %v1251_v25 = vld [vmem:[%s1885_s2 + $0xa8] ss:$16 sps:$4 sm:$0xff]   ;;  %v1252_v26 = vld [vmem:[%s1885_s2 + $0xc4] ss:$16 sps:$4 sm:$0xff]   ;;  %v1254_v27 = vld [vmem:[%s1885_s2 + $0xcc] ss:$16 sps:$4 sm:$0xff]  }
  0x1d   :  { %v1256_v28 = vld [vmem:[%s1885_s2 + $0xc0] ss:$16 sps:$4 sm:$0xff]   ;;  %v1257_v29 = vld [vmem:[%s1885_s2 + $0xc8] ss:$16 sps:$4 sm:$0xff]   ;;  %v1258_v30 = vld [vmem:[%s1885_s2 + $0xe4] ss:$16 sps:$4 sm:$0xff]  }
  0x1e   :  { %278 = vmatpush1.bf16.msra.mxu0 %v1232_v12  ;;  %329 = vmatpush1.bf16.msra.mxu1 %v1233_v13  ;;  %v1260_v31 = vld [vmem:[%s1885_s2 + $0xec] ss:$16 sps:$4 sm:$0xff]   ;;  %v1262_v32 = vld [vmem:[%s1885_s2 + $0xe0] ss:$16 sps:$4 sm:$0xff]   ;;  %v1263_v33 = vld [vmem:[%s1885_s2 + $0xe8] ss:$16 sps:$4 sm:$0xff]  }
  0x1f   :  { %279 = vmatprep.subr.bf16.mxu0 %v1234_v14  ;;  %330 = vmatprep.subr.bf16.mxu1 %v1236_v15  ;;  %v54_v34 = vld [vmem:[#allocation2] sm:$0xff]  ;;  %v55_v35 = vld [vmem:[#allocation2 + $0x8] sm:$0xff]  ;;  %v56_v47 = vld [vmem:[#allocation2 + $0x10] sm:$0xff]  ;;  %v1384_v10 = vmov 0.0   ;;  %v1385_v11 = vmov 0.0|0.0  }
  0x20   :  { %v1543_v36 = vld [vmem:[%s1886_s3 + $0x4] ss:$16 sps:$4 sm:$0xff]   ;;  %v1548_v37 = vld [vmem:[%s1886_s3 + $0xc] ss:$16 sps:$4 sm:$0xff]   ;;  %v57_v38 = vpack.c.bf16 %v55_v35, %v54_v34  ;;  %v1553_v39 = vld [vmem:[%s1886_s3] ss:$16 sps:$4 sm:$0xff]   ;;  %v58_v49 = vpack.c.bf16 %v56_v47, %v56_v47 }
  0x21   :  { %v1558_v40 = vld [vmem:[%s1886_s3 + $0x8] ss:$16 sps:$4 sm:$0xff]   ;;  %v1565_v41 = vld [vmem:[%s1886_s3 + $0x24] ss:$16 sps:$4 sm:$0xff]   ;;  %v1570_v42 = vld [vmem:[%s1886_s3 + $0x2c] ss:$16 sps:$4 sm:$0xff]  }
  0x22   :  { %280 = vmatpush1.bf16.msra.mxu0 %v1238_v16  ;;  %331 = vmatpush1.bf16.msra.mxu1 %v1239_v17  ;;  %v1577_v43 = vld [vmem:[%s1886_s3 + $0x20] ss:$16 sps:$4 sm:$0xff]   ;;  %v1582_v44 = vld [vmem:[%s1886_s3 + $0x28] ss:$16 sps:$4 sm:$0xff]   ;;  %v1589_v45 = vld [vmem:[%s1886_s3 + $0x44] ss:$16 sps:$4 sm:$0xff]  }
  0x23   :  { %281 = vmatprep.subr.bf16.mxu0 %v1240_v18  ;;  %332 = vmatprep.subr.bf16.mxu1 %v1242_v19  ;;  %v1594_v46 = vld [vmem:[%s1886_s3 + $0x4c] ss:$16 sps:$4 sm:$0xff]   ;;  %v1601_v48 = vld [vmem:[%s1886_s3 + $0x40] ss:$16 sps:$4 sm:$0xff]   ;;  %v1608_v50 = vld [vmem:[%s1886_s3 + $0x48] ss:$16 sps:$4 sm:$0xff]  }
  0x24   :  { %v1613_v51 = vld [vmem:[%s1886_s3 + $0x64] ss:$16 sps:$4 sm:$0xff]   ;;  %v1620_v52 = vld [vmem:[%s1886_s3 + $0x6c] ss:$16 sps:$4 sm:$0xff]   ;;  %v1627_v53 = vld [vmem:[%s1886_s3 + $0x60] ss:$16 sps:$4 sm:$0xff]  }
  0x25   :  { %v1632_v54 = vld [vmem:[%s1886_s3 + $0x68] ss:$16 sps:$4 sm:$0xff]   ;;  %v1639_v55 = vld [vmem:[%s1886_s3 + $0x84] ss:$16 sps:$4 sm:$0xff]   ;;  %v1644_v56 = vld [vmem:[%s1886_s3 + $0x8c] ss:$16 sps:$4 sm:$0xff]  }
  0x26   :  { %282 = vmatpush1.bf16.msra.mxu0 %v1244_v20  ;;  %333 = vmatpush1.bf16.msra.mxu1 %v1245_v21  ;;  %v1653_v57 = vld [vmem:[%s1886_s3 + $0x80] ss:$16 sps:$4 sm:$0xff]   ;;  %v1658_v58 = vld [vmem:[%s1886_s3 + $0x88] ss:$16 sps:$4 sm:$0xff]   ;;  %v1665_v59 = vld [vmem:[%s1886_s3 + $0xa4] ss:$16 sps:$4 sm:$0xff]   ;;  %v93_v20 = vlaneseq }
  0x27   :  { %283 = vmatprep.subr.bf16.mxu0 %v1246_v22  ;;  %334 = vmatprep.subr.bf16.mxu1 %v1248_v23  ;;  %v1670_v60 = vld [vmem:[%s1886_s3 + $0xac] ss:$16 sps:$4 sm:$0xff]   ;;  %v1677_v61 = vld [vmem:[%s1886_s3 + $0xa0] ss:$16 sps:$4 sm:$0xff]   ;;  %v1682_v62 = vld [vmem:[%s1886_s3 + $0xa8] ss:$16 sps:$4 sm:$0xff]  }
  0x28   :  { %v1689_v63 = vld [vmem:[%s1886_s3 + $0xc4] ss:$16 sps:$4 sm:$0xff]   ;;  %v1694_v0 = vld [vmem:[%s1886_s3 + $0xcc] ss:$16 sps:$4 sm:$0xff]   ;;  %v1701_v1 = vld [vmem:[%s1886_s3 + $0xc0] ss:$16 sps:$4 sm:$0xff]  }
  0x29   :  { %v1706_v2 = vld [vmem:[%s1886_s3 + $0xc8] ss:$16 sps:$4 sm:$0xff]   ;;  %v1713_v4 = vld [vmem:[%s1886_s3 + $0xe4] ss:$16 sps:$4 sm:$0xff]   ;;  %v1718_v5 = vld [vmem:[%s1886_s3 + $0xec] ss:$16 sps:$4 sm:$0xff]  }
  0x2a   :  { %284 = vmatpush1.bf16.msra.mxu0 %v1250_v24  ;;  %335 = vmatpush1.bf16.msra.mxu1 %v1251_v25  ;;  %v1725_v6 = vld [vmem:[%s1886_s3 + $0xe0] ss:$16 sps:$4 sm:$0xff]   ;;  %v1730_v7 = vld [vmem:[%s1886_s3 + $0xe8] ss:$16 sps:$4 sm:$0xff]   ;;  %409 = vst [vmem:[#allocation3] sm:$0xff] %v1384_v10  ;;  %410 = vst [vmem:[#allocation3 + $0x8] sm:$0xff] %v1384_v10 }
  0x2b   :  { %285 = vmatprep.subr.bf16.mxu0 %v1252_v26  ;;  %336 = vmatprep.subr.bf16.mxu1 %v1254_v27  ;;  %v407_v8 = vld [vmem:[%s1888_s5] sm:$0xff]  ;;  %411 = vst [vmem:[#allocation3 + $0x10] sm:$0xff] %v1384_v10  ;;  %1187 = vst [vmem:[%s1890_s7 + $0x10] sm:$0xff] %v1385_v11   ;;  %v94_v21 = vshrl.u32 %v93_v20, 7 }
  0x2c   :  { %v425_v9 = vpack.c.bf16 %v407_v8, %v407_v8  ;;  %1188 = vst [vmem:[%s1890_s7 + $0x18] sm:$0xff] %v1385_v11   ;;  %1189 = vst [vmem:[%s1890_s7 + $0x20] sm:$0xff] %v1385_v11   ;;  %v91_v24 = vld [vmem:[%s1887_s4] sm:$0xf] }
  0x2d   :  { %1190 = vst [vmem:[%s1890_s7 + $0x28] sm:$0xff] %v1385_v11   ;;  %1191 = vst [vmem:[%s1890_s7 + $0x30] sm:$0xff] %v1385_v11   ;;  %v95_v22 = vsub.s32 0, %v94_v21  ;;  %v103_v23 = vsub.s32 2, %v94_v21  ;;  %v99_v25 = vsub.s32 1, %v94_v21  ;;  %v107_v26 = vsub.s32 3, %v94_v21 }
  0x2e   :  { %286 = vmatpush1.bf16.msra.mxu0 %v1256_v28  ;;  %337 = vmatpush1.bf16.msra.mxu1 %v1257_v29  ;;  %1192 = vst [vmem:[%s1890_s7 + $0x38] sm:$0xff] %v1385_v11  }
  0x2f   :  { %287 = vmatprep.subr.bf16.mxu0 %v1258_v30  ;;  %338 = vmatprep.subr.bf16.mxu1 %v1260_v31  ;;  %v1807_v27 = vrot.slane %v91_v24, %v95_v22  ;;  %v1809_v28 = vrot.slane %v91_v24, %v103_v23  ;;  %v1811_v29 = vrot.slane %v91_v24, %v99_v25 }
  0x30   :  { %v1813_v30 = vrot.slane %v91_v24, %v107_v26 }
  0x32   :  { %288 = vmatpush1.bf16.msra.mxu0 %v1262_v32  ;;  %339 = vmatpush1.bf16.msra.mxu1 %v1263_v33 }
  0x33   :  { %586 = vmatprep.subr.bf16.mxu0 %v1543_v36  ;;  %627 = vmatprep.subr.bf16.mxu1 %v1548_v37 }
  0x35   :  { %306 = vmatmul.mubr.bf16.vlgmr.msra.gmra.mrb[0].mxu0 %v57_v38  ;;  %357 = vmatmul.mubr.bf16.vlgmr.msra.gmra.mrb[0].mxu1 %v57_v38 }
  0x36   :  { %587 = vmatpush1.bf16.msra.mxu0 %v1553_v39  ;;  %628 = vmatpush1.bf16.msra.mxu1 %v1558_v40 }
  0x37   :  { %588 = vmatprep.subr.bf16.mxu0 %v1565_v41  ;;  %629 = vmatprep.subr.bf16.mxu1 %v1570_v42 }
  0x38   :  { %315 = vmatprep.mubr.bf16.mxu0 %v1383_v3  ;;  %366 = vmatprep.mubr.bf16.mxu1 %v1383_v3 }
  0x3a   :  { %589 = vmatpush1.bf16.msra.mxu0 %v1577_v43  ;;  %630 = vmatpush1.bf16.msra.mxu1 %v1582_v44 }
  0x3b   :  { %590 = vmatprep.subr.bf16.mxu0 %v1589_v45  ;;  %631 = vmatprep.subr.bf16.mxu1 %v1594_v46 }
  0x3d   :  { %316 = vmatmul.mubr.bf16.gmra.mrb[4].mxu0 %v58_v49  ;;  %367 = vmatmul.mubr.bf16.gmra.mrb[4].mxu1 %v58_v49 }
  0x3e   :  { %591 = vmatpush1.bf16.msra.mxu0 %v1601_v48  ;;  %632 = vmatpush1.bf16.msra.mxu1 %v1608_v50 }
  0x3f   :  { %592 = vmatprep.subr.bf16.mxu0 %v1613_v51  ;;  %633 = vmatprep.subr.bf16.mxu1 %v1620_v52 }
  0x40   :  { %618 = vmatprep.mubr.bf16.mxu0 %v1383_v3  ;;  %659 = vmatprep.mubr.bf16.mxu1 %v1383_v3 }
  0x42   :  { %593 = vmatpush1.bf16.msra.mxu0 %v1627_v53  ;;  %634 = vmatpush1.bf16.msra.mxu1 %v1632_v54 }
  0x43   :  { %594 = vmatprep.subr.bf16.mxu0 %v1639_v55  ;;  %635 = vmatprep.subr.bf16.mxu1 %v1644_v56 }
  0x46   :  { %595 = vmatpush1.bf16.msra.mxu0 %v1653_v57  ;;  %636 = vmatpush1.bf16.msra.mxu1 %v1658_v58 }
  0x47   :  { %596 = vmatprep.subr.bf16.mxu0 %v1665_v59  ;;  %637 = vmatprep.subr.bf16.mxu1 %v1670_v60 }
  0x4a   :  { %597 = vmatpush1.bf16.msra.mxu0 %v1677_v61  ;;  %638 = vmatpush1.bf16.msra.mxu1 %v1682_v62 }
  0x4b   :  { %598 = vmatprep.subr.bf16.mxu0 %v1689_v63  ;;  %639 = vmatprep.subr.bf16.mxu1 %v1694_v0 }
  0x4e   :  { %599 = vmatpush1.bf16.msra.mxu0 %v1701_v1  ;;  %640 = vmatpush1.bf16.msra.mxu1 %v1706_v2 }
  0x4f   :  { %600 = vmatprep.subr.bf16.mxu0 %v1713_v4  ;;  %641 = vmatprep.subr.bf16.mxu1 %v1718_v5 }
  0x52   :  { %601 = vmatpush1.bf16.msra.mxu0 %v1725_v6  ;;  %642 = vmatpush1.bf16.msra.mxu1 %v1730_v7 }
  0x53   :  { %698 = vmatprep.subr.bf16.mxu0 %v1543_v36  ;;  %739 = vmatprep.subr.bf16.mxu1 %v1548_v37 }
  0x55   :  { %619 = vmatmul.mubr.bf16.vlgmr.msra.gmra.mrb[8].mxu0 %v425_v9  ;;  %660 = vmatmul.mubr.bf16.vlgmr.msra.gmra.mrb[8].mxu1 %v425_v9 }
  0x56   :  { %699 = vmatpush1.bf16.msra.mxu0 %v1553_v39  ;;  %740 = vmatpush1.bf16.msra.mxu1 %v1558_v40 }
  0x57   :  { %700 = vmatprep.subr.bf16.mxu0 %v1565_v41  ;;  %741 = vmatprep.subr.bf16.mxu1 %v1570_v42 }
  0x58   :  { %730 = vmatprep.mubr.bf16.mxu0 %v1383_v3  ;;  %771 = vmatprep.mubr.bf16.mxu1 %v1383_v3 }
  0x5a   :  { %701 = vmatpush1.bf16.msra.mxu0 %v1577_v43  ;;  %742 = vmatpush1.bf16.msra.mxu1 %v1582_v44 }
  0x5b   :  { %702 = vmatprep.subr.bf16.mxu0 %v1589_v45  ;;  %743 = vmatprep.subr.bf16.mxu1 %v1594_v46 }
  0x5e   :  { %703 = vmatpush1.bf16.msra.mxu0 %v1601_v48  ;;  %744 = vmatpush1.bf16.msra.mxu1 %v1608_v50 }
  0x5f   :  { %704 = vmatprep.subr.bf16.mxu0 %v1613_v51  ;;  %745 = vmatprep.subr.bf16.mxu1 %v1620_v52 }
  0x62   :  { %705 = vmatpush1.bf16.msra.mxu0 %v1627_v53  ;;  %746 = vmatpush1.bf16.msra.mxu1 %v1632_v54 }
  0x63   :  { %706 = vmatprep.subr.bf16.mxu0 %v1639_v55  ;;  %747 = vmatprep.subr.bf16.mxu1 %v1644_v56 }
  0x66   :  { %707 = vmatpush1.bf16.msra.mxu0 %v1653_v57  ;;  %748 = vmatpush1.bf16.msra.mxu1 %v1658_v58 }
  0x67   :  { %708 = vmatprep.subr.bf16.mxu0 %v1665_v59  ;;  %749 = vmatprep.subr.bf16.mxu1 %v1670_v60 }
  0x6a   :  { %709 = vmatpush1.bf16.msra.mxu0 %v1677_v61  ;;  %750 = vmatpush1.bf16.msra.mxu1 %v1682_v62 }
  0x6b   :  { %710 = vmatprep.subr.bf16.mxu0 %v1689_v63  ;;  %751 = vmatprep.subr.bf16.mxu1 %v1694_v0 }
  0x6e   :  { %711 = vmatpush1.bf16.msra.mxu0 %v1701_v1  ;;  %752 = vmatpush1.bf16.msra.mxu1 %v1706_v2 }
  0x6f   :  { %712 = vmatprep.subr.bf16.mxu0 %v1713_v4  ;;  %753 = vmatprep.subr.bf16.mxu1 %v1718_v5 }
  0x72   :  { %713 = vmatpush1.bf16.msra.mxu0 %v1725_v6  ;;  %754 = vmatpush1.bf16.msra.mxu1 %v1730_v7 }
  0x73   :  { %811 = vmatprep.subr.bf16.mxu0 %v1543_v36  ;;  %852 = vmatprep.subr.bf16.mxu1 %v1548_v37 }
 0x108   :  { %v307_v12 = vpop.f32.mrb[0].mxu0  ;;  %v358_v13 = vpop.f32.mrb[0].mxu1 }
 0x109   :  { %v309_v14 = vpop.f32.mrb[1].mxu0  ;;  %v360_v15 = vpop.f32.mrb[1].mxu1  ;;  %v308_v31 = vadd.f32 %v307_v12, %v1807_v27  ;;  %v359_v32 = vadd.f32 %v358_v13, %v1809_v28 }
 0x10a   :  { %v1796_v16 = vpop.f32.mrb[2].mxu0  ;;  %v1798_v17 = vpop.f32.mrb[2].mxu1  ;;  %v310_v33 = vadd.f32 %v309_v14, %v1811_v29  ;;  %v361_v34 = vadd.f32 %v360_v15, %v1813_v30 }
 0x10b   :  { %v1800_v18 = vpop.f32.mrb[3].mxu0  ;;  %v1802_v19 = vpop.f32.mrb[3].mxu1 }
 0x128   :  { %v620_v35 = vpop.f32.mrb[8].mxu0  ;;  %v661_v36 = vpop.f32.mrb[8].mxu1 }
 0x129   :  { %v668_v37 = vadd.f32 %v620_v35, %v308_v31  ;;  %v670_v38 = vadd.f32 %v661_v36, %v359_v32  ;;  %v622_v47 = vpop.f32.mrb[9].mxu0  ;;  %v663_v49 = vpop.f32.mrb[9].mxu1  ;;  %v408_v32 = vld [vmem:[%s1889_s6] sm:$0xff] }
 0x12a   :  { %v669_v8 = vadd.f32 %v622_v47, %v310_v33  ;;  %v671_v9 = vadd.f32 %v663_v49, %v361_v34  ;;  %v624_v11 = vpop.f32.mrb[10].mxu0  ;;  %v665_v20 = vpop.f32.mrb[10].mxu1 }
 0x12b   :  { %v1105_v21 = vmul.f32 -1.442695, %v668_v37  ;;  %v625_v22 = vpop.f32.mrb[11].mxu0  ;;  %v666_v23 = vpop.f32.mrb[11].mxu1 }
 0x12c   :  { %v1106_v12 = vmul.f32 -1.442695, %v669_v8  ;;  %v1107_v13 = vmul.f32 -1.442695, %v671_v9 }
 0x12d   :  { %1312 = vpow2.f32 %v1105_v21 }
 0x12e   :  { %1314 = vpow2.f32 %v1106_v12 }
 0x12f   :  { %1316 = vpow2.f32 %v1107_v13 }
 0x130   :  { %1318 = vtanh.f32 %v670_v38 }
 0x137   :  { %v1313_v14 = vpop.eup %1312 }
 0x138   :  { %v1315_v24 = vpop.eup %1314  ;;  %v675_v15 = vadd.f32 1.0, %v1313_v14 }
 0x139   :  { %v681_v25 = vadd.f32 1.0, %v1315_v24  ;;  %v1317_v26 = vpop.eup %1316 }
 0x13a   :  { %1320 = vrcp.f32 %v675_v15  ;;  %v1319_v31 = vpop.eup %1318  ;;  %v688_v36 = vadd.f32 1.0, %v1317_v26 }
 0x13b   :  { %1322 = vrcp.f32 %v681_v25 }
 0x13c   :  { %1324 = vrcp.f32 %v688_v36 }
 0x144   :  { %v1321_v33 = vpop.eup %1320 }
 0x145   :  { %v1323_v34 = vpop.eup %1322  ;;  %v692_v35 = vmul.f32 %v1321_v33, %v1319_v31 }
 0x146   :  { %v691_v37 = vmul.f32 %v1323_v34, %v408_v32  ;;  %v1325_v38 = vpop.eup %1324 }
 0x148   :  { %v1822_v47 = vadd.f32 %v692_v35, %v691_v37 }
 0x14a   :  { %1326 = vtanh.f32 %v1822_v47 }
 0x154   :  { %v1327_v49 = vpop.eup %1326 }
 0x155   :  { %v695_v8 = vmul.f32 %v1327_v49, %v1325_v38 }
 0x157   :  { %696 = vst [vmem:[#allocation3] ss:$3 sm:$0xff] %v695_v8  ;;  %v697_v9 = vpack.c.bf16 %v695_v8, %v695_v8 }
 0x159   :  { %731 = vmatmul.mubr.bf16.vlgmr.msra.gmra.mrb[12].mxu0 %v697_v9  ;;  %772 = vmatmul.mubr.bf16.vlgmr.msra.gmra.mrb[12].mxu1 %v697_v9 }
 0x15a   :  { %812 = vmatpush1.bf16.msra.mxu0 %v1553_v39  ;;  %853 = vmatpush1.bf16.msra.mxu1 %v1558_v40  ;;  %v363_v39 = vadd.f32 %v1798_v17, %v1809_v28  ;;  %v314_v40 = vadd.f32 %v1800_v18, %v1811_v29 }
 0x15b   :  { %813 = vmatprep.subr.bf16.mxu0 %v1565_v41  ;;  %854 = vmatprep.subr.bf16.mxu1 %v1570_v42  ;;  %v365_v41 = vadd.f32 %v1802_v19, %v1813_v30 }
 0x15c   :  { %843 = vmatprep.mubr.bf16.mxu0 %v1383_v3  ;;  %884 = vmatprep.mubr.bf16.mxu1 %v1383_v3  ;;  %v312_v3 = vadd.f32 %v1796_v16, %v1807_v27 }
 0x15e   :  { %814 = vmatpush1.bf16.msra.mxu0 %v1577_v43  ;;  %855 = vmatpush1.bf16.msra.mxu1 %v1582_v44 }
 0x15f   :  { %815 = vmatprep.subr.bf16.mxu0 %v1589_v45  ;;  %856 = vmatprep.subr.bf16.mxu1 %v1594_v46 }
 0x162   :  { %816 = vmatpush1.bf16.msra.mxu0 %v1601_v48  ;;  %857 = vmatpush1.bf16.msra.mxu1 %v1608_v50 }
 0x163   :  { %817 = vmatprep.subr.bf16.mxu0 %v1613_v51  ;;  %858 = vmatprep.subr.bf16.mxu1 %v1620_v52 }
 0x166   :  { %818 = vmatpush1.bf16.msra.mxu0 %v1627_v53  ;;  %859 = vmatpush1.bf16.msra.mxu1 %v1632_v54 }
 0x167   :  { %819 = vmatprep.subr.bf16.mxu0 %v1639_v55  ;;  %860 = vmatprep.subr.bf16.mxu1 %v1644_v56 }
 0x16a   :  { %820 = vmatpush1.bf16.msra.mxu0 %v1653_v57  ;;  %861 = vmatpush1.bf16.msra.mxu1 %v1658_v58 }
 0x16b   :  { %821 = vmatprep.subr.bf16.mxu0 %v1665_v59  ;;  %862 = vmatprep.subr.bf16.mxu1 %v1670_v60 }
 0x16e   :  { %822 = vmatpush1.bf16.msra.mxu0 %v1677_v61  ;;  %863 = vmatpush1.bf16.msra.mxu1 %v1682_v62 }
 0x16f   :  { %823 = vmatprep.subr.bf16.mxu0 %v1689_v63  ;;  %864 = vmatprep.subr.bf16.mxu1 %v1694_v0 }
 0x172   :  { %824 = vmatpush1.bf16.msra.mxu0 %v1701_v1  ;;  %865 = vmatpush1.bf16.msra.mxu1 %v1706_v2 }
 0x173   :  { %825 = vmatprep.subr.bf16.mxu0 %v1713_v4  ;;  %866 = vmatprep.subr.bf16.mxu1 %v1718_v5 }
 0x176   :  { %826 = vmatpush1.bf16.msra.mxu0 %v1725_v6  ;;  %867 = vmatpush1.bf16.msra.mxu1 %v1730_v7 }
 0x22c   :  { %v732_v42 = vpop.f32.mrb[12].mxu0  ;;  %v773_v43 = vpop.f32.mrb[12].mxu1 }
 0x22d   :  { %v780_v44 = vadd.f32 %v732_v42, %v312_v3  ;;  %v782_v45 = vadd.f32 %v773_v43, %v363_v39  ;;  %v734_v46 = vpop.f32.mrb[13].mxu0  ;;  %v775_v48 = vpop.f32.mrb[13].mxu1 }
 0x22e   :  { %v781_v50 = vadd.f32 %v734_v46, %v314_v40  ;;  %v783_v51 = vadd.f32 %v775_v48, %v365_v41  ;;  %v736_v52 = vpop.f32.mrb[14].mxu0  ;;  %v777_v53 = vpop.f32.mrb[14].mxu1 }
 0x22f   :  { %v1108_v54 = vmul.f32 -1.442695, %v780_v44  ;;  %v737_v55 = vpop.f32.mrb[15].mxu0  ;;  %v778_v56 = vpop.f32.mrb[15].mxu1 }
 0x230   :  { %v1109_v57 = vmul.f32 -1.442695, %v781_v50  ;;  %v1110_v58 = vmul.f32 -1.442695, %v783_v51 }
 0x231   :  { %1328 = vpow2.f32 %v1108_v54 }
 0x232   :  { %1330 = vpow2.f32 %v1109_v57 }
 0x233   :  { %1332 = vpow2.f32 %v1110_v58 }
 0x234   :  { %1334 = vtanh.f32 %v782_v45 }
 0x23b   :  { %v1329_v59 = vpop.eup %1328 }
 0x23c   :  { %v1331_v60 = vpop.eup %1330  ;;  %v787_v61 = vadd.f32 1.0, %v1329_v59 }
 0x23d   :  { %v793_v62 = vadd.f32 1.0, %v1331_v60  ;;  %v1333_v63 = vpop.eup %1332 }
 0x23e   :  { %1336 = vrcp.f32 %v787_v61  ;;  %v1335_v0 = vpop.eup %1334  ;;  %v800_v5 = vadd.f32 1.0, %v1333_v63 }
 0x23f   :  { %1338 = vrcp.f32 %v793_v62 }
 0x240   :  { %1340 = vrcp.f32 %v800_v5 }
 0x248   :  { %v1337_v1 = vpop.eup %1336 }
 0x249   :  { %v1339_v2 = vpop.eup %1338  ;;  %v804_v4 = vmul.f32 %v1337_v1, %v1335_v0 }
 0x24a   :  { %v803_v6 = vmul.f32 %v1339_v2, %v1822_v47  ;;  %v1341_v16 = vpop.eup %1340 }
 0x24c   :  { %v805_v7 = vadd.f32 %v804_v4, %v803_v6 }
 0x24e   :  { %1342 = vtanh.f32 %v805_v7 }
 0x258   :  { %v1343_v17 = vpop.eup %1342 }
 0x259   :  { %v807_v18 = vmul.f32 %v1343_v17, %v1341_v16 }
 0x25b   :  { %809 = vst [vmem:[#allocation3 + $0x1] ss:$3 sm:$0xff] %v807_v18  ;;  %v810_v19 = vpack.c.bf16 %v807_v18, %v807_v18 }
 0x25d   :  { %844 = vmatmul.mubr.bf16.vlgmr.msra.gmra.mrb[4].mxu0 %v810_v19  ;;  %885 = vmatmul.mubr.bf16.vlgmr.msra.gmra.mrb[4].mxu1 %v810_v19 }
 0x330   :  { %v845_v11 = vpop.f32.mrb[4].mxu0  ;;  %v886_v20 = vpop.f32.mrb[4].mxu1 }
 0x331   :  { %v1193_v21 = vadd.f32 %v845_v11, %v1807_v27  ;;  %v847_v22 = vpop.f32.mrb[5].mxu0  ;;  %v888_v23 = vpop.f32.mrb[5].mxu1  ;;  %v1195_v33 = vadd.f32 %v886_v20, %v1809_v28 }
 0x332   :  { %v1194_v12 = vadd.f32 %v847_v22, %v1811_v29  ;;  %v849_v13 = vpop.f32.mrb[6].mxu0  ;;  %v890_v14 = vpop.f32.mrb[6].mxu1  ;;  %v1196_v31 = vadd.f32 %v888_v23, %v1813_v30 }
 0x333   :  { %v1111_v24 = vmul.f32 -1.442695, %v1193_v21  ;;  %v850_v15 = vpop.f32.mrb[7].mxu0  ;;  %v891_v25 = vpop.f32.mrb[7].mxu1 }
 0x334   :  { %v1112_v26 = vmul.f32 -1.442695, %v1194_v12  ;;  %v1113_v32 = vmul.f32 -1.442695, %v1196_v31 }
 0x335   :  { %1344 = vpow2.f32 %v1111_v24 }
 0x336   :  { %1346 = vpow2.f32 %v1112_v26 }
 0x337   :  { %1348 = vpow2.f32 %v1113_v32 }
 0x338   :  { %1350 = vtanh.f32 %v1195_v33 }
 0x33f   :  { %v1345_v34 = vpop.eup %1344 }
 0x340   :  { %v1347_v35 = vpop.eup %1346  ;;  %v900_v27 = vadd.f32 1.0, %v1345_v34 }
 0x341   :  { %v906_v36 = vadd.f32 1.0, %v1347_v35  ;;  %v1349_v29 = vpop.eup %1348 }
 0x342   :  { %1352 = vrcp.f32 %v900_v27  ;;  %v1351_v37 = vpop.eup %1350  ;;  %v913_v8 = vadd.f32 1.0, %v1349_v29 }
 0x343   :  { %1354 = vrcp.f32 %v906_v36 }
 0x344   :  { %1356 = vrcp.f32 %v913_v8 }
 0x34c   :  { %v1353_v47 = vpop.eup %1352 }
 0x34d   :  { %v1355_v38 = vpop.eup %1354  ;;  %v917_v49 = vmul.f32 %v1353_v47, %v1351_v37 }
 0x34e   :  { %v916_v9 = vmul.f32 %v1355_v38, %v805_v7  ;;  %v1357_v28 = vpop.eup %1356 }
 0x350   :  { %v918_v3 = vadd.f32 %v917_v49, %v916_v9 }
 0x352   :  { %1358 = vtanh.f32 %v918_v3  ;;  %1020 = vst [vmem:[%s1892_s9] sm:$0xff] %v918_v3 }
 0x35c   :  { %v1359_v30 = vpop.eup %1358 }
 0x35d   :  { %v920_v39 = vmul.f32 %v1359_v30, %v1357_v28 }
 0x35f   :  { %922 = vst [vmem:[#allocation3 + $0x2] ss:$3 sm:$0xff] %v920_v39  ;;  %1019 = vst [vmem:[%s1891_s8] sm:$0xff] %v920_v39 }
 0x366   :  { %v923_v40 = vld [vmem:[#allocation3] sm:$0xff]  ;;  %v924_v41 = vld [vmem:[#allocation3 + $0x8] sm:$0xff]  ;;  %v925_v42 = vld [vmem:[#allocation3 + $0x10] sm:$0xff] }
 0x367   :  { %v1149_v43 = vpack.c.bf16 %v924_v41, %v923_v40  ;;  %v1154_v44 = vpack.c.bf16 %v1384_v10, %v925_v42 }
 0x369   :  { %1150 = vst [vmem:[%s1890_s7] sm:$0xff] %v1149_v43   ;;  %1186 = vst [vmem:[%s1890_s7 + $0x8] sm:$0xff] %v1154_v44  }
 0x36a   :  { %1033 = vsyncpa [#allocation5], 1 }

</bundles_post_ra>
